<compile_context>
chip_gen: v5e
topology: v5e:2x2
jax: 0.10.0
libtpu: 0.0.40
codegen_flags: <defaults>
</compile_context>

<pallas_src>
import functools

import jax
import jax.numpy as jnp
from jax.experimental import pallas as pl
from jax.experimental.pallas import tpu as pltpu


# ----------------------------------------------------------------------------
# Model dimensions (synthetic stand-in backbone)
# ----------------------------------------------------------------------------
C_IN = 3          # RGB input
C1 = 16           # stem conv1 channels (per branch)
C_FEAT = 64       # backbone feature dim per branch (encoder.embed_dim)
EMBED_DIM = 32    # args.embed_dim
GEM_P = 3.0       # args.p
GEM_EPS = 1e-6
TEACHERS = ("res_gem", "res_delg")   # second ends with 'delg' -> BGR channel flip

N_BRANCH = 1 + len(TEACHERS)         # student + both teachers in one backbone
C1_ALL = N_BRANCH * C1               # 48 merged conv1 output channels
CF_ALL = N_BRANCH * C_FEAT           # 192 merged conv2 output channels

MATMUL_INPUT_DTYPE = jnp.bfloat16    # MXU inputs (f32 accumulate / f32 epilogue)
ACT_DTYPE = jnp.bfloat16             # HBM activation dtype between stages
VMEM_LIMIT_BYTES = 32 * 1024 * 1024  # safe on v5e/v6e (128MiB) and v7x (64MiB)


def _round_up(v, m):
    return (v + m - 1) // m * m


def _pick_m_tiling(m, cap=2048, align=16):
    """Pick an M tile (multiple of `align`) and padded M; keep >=2 blocks on
    the 'parallel' axis when possible so v7x's 2 TensorCores both get work."""
    tm = min(cap, _round_up(m, align))
    if tm >= 2 * align and _round_up(m, tm) // tm < 2:
        tm = _round_up((m + 1) // 2, align)
    return tm, _round_up(m, tm)


def _pick_hw_chunk(hw, cap=2048):
    """Largest divisor of hw that is a multiple of 16 (or 8) and <= cap."""
    if hw <= cap:
        return hw
    for align in (16, 8):
        c = cap // align * align
        while c >= align:
            if hw % c == 0:
                return c
            c -= align
    # TODO(synk): padded/masked HW tiling for awkward (e.g. odd) spatial sizes.
    return hw


# ----------------------------------------------------------------------------
# Pallas kernels
# ----------------------------------------------------------------------------
def _conv_relu_kernel(x_ref, w_ref, b_ref, o_ref):
    """Single-K fast path: o = relu(x @ w + b).  bf16 in/out, f32 accumulate.
    No accumulator scratch / pl.when - K always fits one block here."""
    y = jnp.dot(x_ref[...], w_ref[...], preferred_element_type=jnp.float32)
    o_ref[...] = jnp.maximum(y + b_ref[...], 0.0).astype(o_ref.dtype)


def _conv2_gem_heads_kernel(p2_ref, w_ref, b_ref, wfc_ref, bfc_ref,
                            mean_ref, pca_ref, stu_ref, tch_ref, acc_ref,
                            *, p, eps, hw, feat_dim, n_teachers):
    """Fused conv2 (block-diagonal over branches) + GeM pooling + all heads.

    grid = (batch 'parallel', HW-chunk 'arbitrary').  The [THW, N] feature
    tile never leaves VMEM; GeM partial sums accumulate into a (1, N) f32
    scratch via an MXU ones-dot; at the last HW chunk the student fc and the
    per-teacher L2 -> PCA -> L2 heads run on the pooled row.
    Channel layout: [student 0:CF | teacher0 CF:2CF | teacher1 2CF:3CF | pad].
    """
    j = pl.program_id(1)

    @pl.when(j == 0)
    def _init():
        acc_ref[...] = jnp.zeros_like(acc_ref)

    y = jnp.dot(p2_ref[...], w_ref[...], preferred_element_type=jnp.float32)
    # conv bias + ReLU + GeM clamp fused (eps > 0 so max(.,0) then max(.,eps)
    # collapses to a single maximum); the raw feature map is never stored.
    x = jnp.maximum(y + b_ref[...], eps)                       # [THW, N] f32
    xp = x * x * x if p == 3.0 else x ** p
    ones = jnp.ones((1, xp.shape[0]), jnp.float32)
    acc_ref[...] += jnp.dot(ones, xp, preferred_element_type=jnp.float32)

    @pl.when(j == pl.num_programs(1) - 1)
    def _heads():
        g = (acc_ref[...] * (1.0 / hw)) ** (1.0 / p)           # [1, N] GeM
        # student head: fc on channels [0, feat_dim)
        stu_ref[...] = (jnp.dot(g[:, :feat_dim], wfc_ref[...],
                                preferred_element_type=jnp.float32)
                        + bfc_ref[...])
        # teacher heads (static unroll, T = 2)
        for t in range(n_teachers):
            gt = g[:, feat_dim * (t + 1):feat_dim * (t + 2)]   # [1, CF]
            gt = gt * jax.lax.rsqrt(jnp.maximum(
                jnp.sum(gt * gt, axis=-1, keepdims=True), 1e-24))   # F.normalize
            yt = jnp.dot(gt - mean_ref[t], pca_ref[t],
                         preferred_element_type=jnp.float32)        # [1, E]
            yt = yt * jax.lax.rsqrt(jnp.maximum(
                jnp.sum(yt * yt, axis=-1, keepdims=True), 1e-24))
            tch_ref[t:t + 1, :] = yt


# ----------------------------------------------------------------------------
# Pallas wrappers
# ----------------------------------------------------------------------------
def conv_relu(x, w, b, *, out_dtype=ACT_DTYPE, tm_cap=2048):
    """relu(X @ W + b); W/b come pre-padded (K mult of 8, N mult of 128)."""
    M, K = x.shape
    KP, NP = w.shape
    assert KP >= K and KP % 8 == 0 and NP % 128 == 0
    if KP > K:
        x = jnp.pad(x, ((0, 0), (0, KP - K)))
    x = x.astype(MATMUL_INPUT_DTYPE)
    TM, MP = _pick_m_tiling(M, tm_cap)
    if MP > M:
        x = jnp.pad(x, ((0, MP - M), (0, 0)))
    out = pl.pallas_call(
        _conv_relu_kernel,
        out_shape=jax.ShapeDtypeStruct((MP, NP), out_dtype),
        grid=(MP // TM,),
        in_specs=[
            pl.BlockSpec((TM, KP), lambda i: (i, 0)),
            pl.BlockSpec((KP, NP), lambda i: (0, 0)),
            pl.BlockSpec((1, NP), lambda i: (0, 0)),
        ],
        out_specs=pl.BlockSpec((TM, NP), lambda i: (i, 0)),
        compiler_params=pltpu.CompilerParams(
            dimension_semantics=("parallel",),
            vmem_limit_bytes=VMEM_LIMIT_BYTES),
    )(x, w, b)
    return out if MP == M else out[:M]


def conv2_gem_heads(p2, prep, *, p=GEM_P, eps=GEM_EPS, hw_cap=2048):
    """Fused conv2 + GeM + student fc + teacher L2/PCA/L2 for all branches."""
    B2, HW2, K2 = p2.shape
    assert K2 == prep["w2"].shape[0]
    N2P = prep["w2"].shape[1]
    T, CF, E = prep["pca_w"].shape
    THW = _pick_hw_chunk(HW2, hw_cap)
    assert HW2 % THW == 0
    stu, tch = pl.pallas_call(
        functools.partial(_conv2_gem_heads_kernel, p=p, eps=eps, hw=HW2,
                          feat_dim=CF, n_teachers=T),
        out_shape=(jax.ShapeDtypeStruct((B2, 1, E), jnp.float32),
                   jax.ShapeDtypeStruct((B2, T, E), jnp.float32)),
        grid=(B2, HW2 // THW),
        in_specs=[
            pl.BlockSpec((None, THW, K2), lambda b, j: (b, j, 0)),
            pl.BlockSpec((K2, N2P), lambda b, j: (0, 0)),
            pl.BlockSpec((1, N2P), lambda b, j: (0, 0)),
            pl.BlockSpec((CF, E), lambda b, j: (0, 0)),
            pl.BlockSpec((1, E), lambda b, j: (0, 0)),
            pl.BlockSpec((T, 1, CF), lambda b, j: (0, 0, 0)),
            pl.BlockSpec((T, CF, E), lambda b, j: (0, 0, 0)),
        ],
        out_specs=(
            pl.BlockSpec((None, 1, E), lambda b, j: (b, 0, 0)),
            pl.BlockSpec((None, T, E), lambda b, j: (b, 0, 0)),
        ),
        scratch_shapes=[pltpu.VMEM((1, N2P), jnp.float32)],
        compiler_params=pltpu.CompilerParams(
            dimension_semantics=("parallel", "arbitrary"),
            vmem_limit_bytes=VMEM_LIMIT_BYTES),
    )(p2, prep["w2"], prep["b2"], prep["wfc"], prep["bfc"],
      prep["pca_mean"], prep["pca_w"])
    return stu.reshape(B2, E), tch


# ----------------------------------------------------------------------------
# Plain-JAX glue: NHWC im2col for 3x3 conv (padding=1), stride s
# K layout is (tap, channel): row index = tap*C + c   (HWIO-flattened weights)
# ----------------------------------------------------------------------------
def im2col_3x3_nhwc(x, stride):
    # TODO(synk): fuse this 3x3 patch gather into the conv kernels (haloed
    # NHWC tiles + 9 shifted dots) to avoid materializing the patch matrix.
    B, H, W, C = x.shape
    Ho = (H + 2 - 3) // stride + 1
    Wo = (W + 2 - 3) // stride + 1
    xp = jnp.pad(x, ((0, 0), (1, 1), (1, 1), (0, 0)))
    cols = []
    for dh in range(3):
        for dw in range(3):
            cols.append(xp[:, dh:dh + (Ho - 1) * stride + 1:stride,
                           dw:dw + (Wo - 1) * stride + 1:stride, :])
    patches = jnp.stack(cols, axis=3)                  # [B, Ho, Wo, 9, C]
    return patches.reshape(B * Ho * Wo, 9 * C), Ho, Wo


# ----------------------------------------------------------------------------
# Parameters (deterministic synthetic stand-in for pretrained weights)
# Conv weight layout: [9*Cin, Cout] with K laid out as (tap, channel).
# ----------------------------------------------------------------------------
def _init_encoder_params(key):
    k1, k2, k3, k4 = jax.random.split(key, 4)
    return {
        "w1": jax.random.normal(k1, (9 * C_IN, C1), jnp.float32) * (1.0 / (9 * C_IN) ** 0.5),
        "b1": jax.random.normal(k2, (C1,), jnp.float32) * 0.01,
        "w2": jax.random.normal(k3, (9 * C1, C_FEAT), jnp.float32) * (1.0 / (9 * C1) ** 0.5),
        "b2": jax.random.normal(k4, (C_FEAT,), jnp.float32) * 0.01,
    }


def init_params(key):
    ks = jax.random.split(key, 4)
    params = {"student": _init_encoder_params(ks[0])}
    params["student"]["wfc"] = jax.random.normal(
        ks[1], (C_FEAT, EMBED_DIM), jnp.float32) * (1.0 / C_FEAT ** 0.5)
    params["student"]["bfc"] = jax.random.normal(ks[2], (EMBED_DIM,), jnp.float32) * 0.01
    params["teachers"] = []
    for t_idx, _ in enumerate(TEACHERS):
        kt = jax.random.fold_in(ks[3], t_idx)
        ka, kb, kc = jax.random.split(kt, 3)
        tparams = _init_encoder_params(ka)
        tparams["pca_mean"] = jax.random.normal(kb, (C_FEAT,), jnp.float32) * 0.01
        tparams["pca_w"] = jax.random.normal(
            kc, (C_FEAT, EMBED_DIM), jnp.float32) * (1.0 / C_FEAT ** 0.5)
        params["teachers"].append(tparams)
    return params


# ----------------------------------------------------------------------------
# One-time parameter prep (hoisted OUT of the jitted forward): fold the BGR
# flip of *delg teachers into conv1, merge all branches' conv1 along N and
# conv2 block-diagonally, pad to MXU-friendly K/N, cast to bf16.
# ----------------------------------------------------------------------------
def _flip_input_channels(w1, c_in):
    """Equivalent to feeding x[:, (2,1,0)] (BGR) through the original weights."""
    return w1.reshape(9, c_in, -1)[:, ::-1, :].reshape(9 * c_in, -1)


def prepare_params(params):
    sp = params["student"]
    tps = params["teachers"]

    # conv1: concat along N -> one kernel for student + both teachers
    w1_cols, b1_cols = [sp["w1"]], [sp["b1"]]
    for name, tp in zip(TEACHERS, tps):
        w1 = tp["w1"]
        if name.endswith("delg") or name.endswith("dolg"):
            w1 = _flip_input_channels(w1, C_IN)
        w1_cols.append(w1)
        b1_cols.append(tp["b1"])
    w1_all = jnp.concatenate(w1_cols, axis=1)                 # [27, 48]
    b1_all = jnp.concatenate(b1_cols, axis=0)                 # [48]
    K1, K1P = 9 * C_IN, _round_up(9 * C_IN, 16)               # 27 -> 32
    N1P = _round_up(C1_ALL, 128)                              # 48 -> 128
    w1p = jnp.pad(w1_all, ((0, K1P - K1), (0, N1P - C1_ALL))).astype(MATMUL_INPUT_DTYPE)
    b1p = jnp.pad(b1_all, (0, N1P - C1_ALL)).astype(jnp.float32).reshape(1, N1P)

    # conv2: block-diagonal across branches; output cols [stu | t0 | t1 | pad]
    K2 = 9 * C1_ALL                                            # 432
    N2P = _round_up(CF_ALL, 128)                               # 192 -> 256
    w2_all = jnp.zeros((9, C1_ALL, N2P), jnp.float32)
    branches = [sp] + list(tps)
    for i, bp in enumerate(branches):
        w2_all = w2_all.at[:, i * C1:(i + 1) * C1,
                           i * C_FEAT:(i + 1) * C_FEAT].set(
            bp["w2"].reshape(9, C1, C_FEAT))
    w2p = w2_all.reshape(K2, N2P).astype(MATMUL_INPUT_DTYPE)
    b2_all = jnp.concatenate([bp["b2"] for bp in branches]
                             + [jnp.zeros((N2P - CF_ALL,), jnp.float32)], axis=0)
    b2p = b2_all.astype(jnp.float32).reshape(1, N2P)

    return {
        "w1": w1p, "b1": b1p, "w2": w2p, "b2": b2p,
        "wfc": sp["wfc"].astype(jnp.float32),
        "bfc": sp["bfc"].astype(jnp.float32).reshape(1, EMBED_DIM),
        "pca_mean": jnp.stack([tp["pca_mean"] for tp in tps])[:, None, :],  # [T,1,CF]
        "pca_w": jnp.stack([tp["pca_w"] for tp in tps]),                    # [T,CF,E]
    }


# ----------------------------------------------------------------------------
# Forward (NHWC end-to-end; x1 & x2 batched; student + teachers share kernels)
# ----------------------------------------------------------------------------
def multi_teacher_distill_forward(prep, x1, x2):
    """MultiTeacherDistillModel.forward: (stu1, stu2, tch1, tch2)."""
    B = x1.shape[0]
    T = len(TEACHERS)
    x = jnp.concatenate([x1, x2], axis=0)                       # [2B, C, H, W]
    x = jnp.transpose(x, (0, 2, 3, 1)).astype(MATMUL_INPUT_DTYPE)  # NHWC + bf16 once
    B2 = x.shape[0]

    # stage 1: shared bf16 patches -> ONE merged conv1 for all three branches
    # (the *delg teacher's BGR flip lives in its weight columns).
    p1, H1, W1 = im2col_3x3_nhwc(x, stride=1)                   # [M1, 27] bf16
    h = conv_relu(p1, prep["w1"], prep["b1"])                   # [M1, 128] bf16
    h = h[:, :C1_ALL].reshape(B2, H1, W1, C1_ALL)               # drop lane pad

    # stage 2: merged block-diagonal conv2 fused with GeM + all heads; the
    # [M2, 192] feature map never hits HBM.
    p2, H2, W2 = im2col_3x3_nhwc(h, stride=2)                   # [M2, 432] bf16
    p2 = p2.reshape(B2, H2 * W2, 9 * C1_ALL)
    stu, tch = conv2_gem_heads(p2, prep)                        # [B2, E], [B2, T, E]
    tch = jax.lax.stop_gradient(tch)                            # teachers: no_grad

    stu1, stu2 = stu[:B], stu[B:]
    tch1 = [tch[:B, t] for t in range(T)]
    tch2 = [tch[B:, t] for t in range(T)]
    return stu1, stu2, tch1, tch2


# ----------------------------------------------------------------------------
if __name__ == "__main__":
    key = jax.random.PRNGKey(0)
    kx1, kx2, kp = jax.random.split(key, 3)

    B, H, W = 2, 16, 16
    x1 = jax.random.normal(kx1, (B, C_IN, H, W), jnp.float32)
    x2 = jax.random.normal(kx2, (B, C_IN, H, W), jnp.float32)

    params = init_params(kp)
    prep = prepare_params(params)          # one-time weight merge/pad/cast

    fwd = jax.jit(multi_teacher_distill_forward)
    stu1, stu2, tch1, tch2 = fwd(prep, x1, x2)
    jax.block_until_ready((stu1, stu2, tch1, tch2))

    assert stu1.shape == (B, EMBED_DIM) and stu2.shape == (B, EMBED_DIM)
    assert len(tch1) == len(TEACHERS) and len(tch2) == len(TEACHERS)
    assert all(t.shape == (B, EMBED_DIM) for t in tch1 + tch2)
    assert all(bool(jnp.all(jnp.isfinite(t))) for t in [stu1, stu2] + tch1 + tch2)
    # teacher outputs are L2-normalized by the PCA layer
    for t in tch1 + tch2:
        nrm = jnp.linalg.norm(t, axis=-1)
        assert bool(jnp.all(jnp.abs(nrm - 1.0) < 1e-3))

    print("KERNEL_OK")
</pallas_src>

<mosaic_0001>
module attributes {stable_mosaic.version = 11 : i64} {
  func.func @_conv_relu_kernel(%arg0: i32, %arg1: memref<512x32xbf16, #tpu.memory_space<vmem>>, %arg2: memref<32x128xbf16, #tpu.memory_space<vmem>>, %arg3: memref<1x128xf32, #tpu.memory_space<vmem>>, %arg4: memref<512x128xbf16, #tpu.memory_space<vmem>>) attributes {dimension_semantics = [#tpu.dimension_semantics<parallel>], iteration_bounds = array<i64: 2>, scalar_prefetch = 0 : i64, scratch_operands = 0 : i64, tpu.core_type = #tpu.core_type<tc>, window_params = [{transform_indices = @transform_0, window_bounds = array<i64: 512, 32>}, {pipeline_mode = #tpu.pipeline_mode<synchronous>, transform_indices = @transform_1, window_bounds = array<i64: 32, 128>}, {pipeline_mode = #tpu.pipeline_mode<synchronous>, transform_indices = @transform_2, window_bounds = array<i64: 1, 128>}, {transform_indices = @transform_3, window_bounds = array<i64: 512, 128>}]} {
    %c0 = arith.constant 0 : index
    %c0_0 = arith.constant 0 : index
    %0 = vector.load %arg1[%c0, %c0_0] : memref<512x32xbf16, #tpu.memory_space<vmem>>, vector<512x32xbf16>
    %c0_1 = arith.constant 0 : index
    %c0_2 = arith.constant 0 : index
    %1 = vector.load %arg2[%c0_1, %c0_2] : memref<32x128xbf16, #tpu.memory_space<vmem>>, vector<32x128xbf16>
    %cst = arith.constant dense<0.000000e+00> : vector<512x128xf32>
    %2 = tpu.matmul %0, %1, %cst {dimension_numbers = #tpu.dot_dimension_numbers<[1], [0], [0], [1], [0, 0, 1, 1], [], []>} : vector<512x32xbf16>, vector<32x128xbf16>, vector<512x128xf32> -> vector<512x128xf32>
    %c0_3 = arith.constant 0 : index
    %c0_4 = arith.constant 0 : index
    %3 = vector.load %arg3[%c0_3, %c0_4] : memref<1x128xf32, #tpu.memory_space<vmem>>, vector<1x128xf32>
    %4 = vector.broadcast %3 : vector<1x128xf32> to vector<512x128xf32>
    %5 = arith.addf %2, %4 : vector<512x128xf32>
    %cst_5 = arith.constant 0.000000e+00 : f32
    %6 = vector.broadcast %cst_5 : f32 to vector<512x128xf32>
    %7 = arith.maximumf %5, %6 : vector<512x128xf32>
    %8 = arith.truncf %7 : vector<512x128xf32> to vector<512x128xbf16>
    %c0_6 = arith.constant 0 : index
    %c0_7 = arith.constant 0 : index
    %9 = vector.load %arg4[%c0_6, %c0_7] : memref<512x128xbf16, #tpu.memory_space<vmem>>, vector<512x128xbf16>
    tpu.vector_store %arg4[%c0_6, %c0_7], %8 {strides = array<i32>} : memref<512x128xbf16, #tpu.memory_space<vmem>>, vector<512x128xbf16>,
    return
  }
  func.func @transform_0(%arg0: i32) -> (i32, i32) {
    %c0_i32 = arith.constant 0 : i32
    %c0_i32_0 = arith.constant 0 : i32
    return %arg0, %c0_i32 : i32, i32
  }
  func.func @transform_1(%arg0: i32) -> (i32, i32) {
    %c0_i32 = arith.constant 0 : i32
    %c0_i32_0 = arith.constant 0 : i32
    %c0_i32_1 = arith.constant 0 : i32
    return %c0_i32, %c0_i32_0 : i32, i32
  }
  func.func @transform_2(%arg0: i32) -> (i32, i32) {
    %c0_i32 = arith.constant 0 : i32
    %c0_i32_0 = arith.constant 0 : i32
    %c0_i32_1 = arith.constant 0 : i32
    return %c0_i32, %c0_i32_0 : i32, i32
  }
  func.func @transform_3(%arg0: i32) -> (i32, i32) {
    %c0_i32 = arith.constant 0 : i32
    %c0_i32_0 = arith.constant 0 : i32
    return %arg0, %c0_i32 : i32, i32
  }
}

module attributes {stable_mosaic.version = 11 : i64} {
  func.func @_conv2_gem_heads_kernel(%arg0: i32, %arg1: i32, %arg2: memref<1x64x432xbf16, #tpu.memory_space<vmem>>, %arg3: memref<432x256xbf16, #tpu.memory_space<vmem>>, %arg4: memref<1x256xf32, #tpu.memory_space<vmem>>, %arg5: memref<64x32xf32, #tpu.memory_space<vmem>>, %arg6: memref<1x32xf32, #tpu.memory_space<vmem>>, %arg7: memref<2x1x64xf32, #tpu.memory_space<vmem>>, %arg8: memref<2x64x32xf32, #tpu.memory_space<vmem>>, %arg9: memref<1x1x32xf32, #tpu.memory_space<vmem>>, %arg10: memref<1x2x32xf32, #tpu.memory_space<vmem>>, %arg11: memref<1x256xf32, #tpu.memory_space<vmem>>) attributes {dimension_semantics = [#tpu.dimension_semantics<parallel>, #tpu.dimension_semantics<arbitrary>], iteration_bounds = array<i64: 4, 1>, scalar_prefetch = 0 : i64, scratch_operands = 1 : i64, tpu.core_type = #tpu.core_type<tc>, window_params = [{transform_indices = @transform_0, window_bounds = array<i64: 1, 64, 432>}, {pipeline_mode = #tpu.pipeline_mode<synchronous>, transform_indices = @transform_1, window_bounds = array<i64: 432, 256>}, {pipeline_mode = #tpu.pipeline_mode<synchronous>, transform_indices = @transform_2, window_bounds = array<i64: 1, 256>}, {pipeline_mode = #tpu.pipeline_mode<synchronous>, transform_indices = @transform_3, window_bounds = array<i64: 64, 32>}, {pipeline_mode = #tpu.pipeline_mode<synchronous>, transform_indices = @transform_4, window_bounds = array<i64: 1, 32>}, {pipeline_mode = #tpu.pipeline_mode<synchronous>, transform_indices = @transform_5, window_bounds = array<i64: 2, 1, 64>}, {pipeline_mode = #tpu.pipeline_mode<synchronous>, transform_indices = @transform_6, window_bounds = array<i64: 2, 64, 32>}, {transform_indices = @transform_7, window_bounds = array<i64: 1, 1, 32>}, {transform_indices = @transform_8, window_bounds = array<i64: 1, 2, 32>}]} {
    %c0_i32 = arith.constant 0 : i32
    %0 = arith.cmpi eq, %arg1, %c0_i32 : i32
    %1 = arith.extui %0 : i1 to i32
    %c0_i32_0 = arith.constant 0 : i32
    %2 = arith.cmpi ne, %1, %c0_i32_0 : i32
    scf.if %2 {
      %cst_16 = arith.constant 0.000000e+00 : f32
      %22 = vector.broadcast %cst_16 : f32 to vector<1x256xf32>
      %c0_17 = arith.constant 0 : index
      %c0_18 = arith.constant 0 : index
      %23 = vector.load %arg11[%c0_17, %c0_18] : memref<1x256xf32, #tpu.memory_space<vmem>>, vector<1x256xf32>
      tpu.vector_store %arg11[%c0_17, %c0_18], %22 {strides = array<i32>} : memref<1x256xf32, #tpu.memory_space<vmem>>, vector<1x256xf32>,
    } else {
    }
    %c0 = arith.constant 0 : index
    %c0_1 = arith.constant 0 : index
    %c0_2 = arith.constant 0 : index
    %3 = vector.load %arg2[%c0, %c0_1, %c0_2] : memref<1x64x432xbf16, #tpu.memory_space<vmem>>, vector<1x64x432xbf16>
    %4 = vector.shape_cast %3 : vector<1x64x432xbf16> to vector<64x432xbf16>
    %c0_3 = arith.constant 0 : index
    %c0_4 = arith.constant 0 : index
    %5 = vector.load %arg3[%c0_3, %c0_4] : memref<432x256xbf16, #tpu.memory_space<vmem>>, vector<432x256xbf16>
    %cst = arith.constant dense<0.000000e+00> : vector<64x256xf32>
    %6 = tpu.matmul %4, %5, %cst {dimension_numbers = #tpu.dot_dimension_numbers<[1], [0], [0], [1], [0, 0, 1, 1], [], []>} : vector<64x432xbf16>, vector<432x256xbf16>, vector<64x256xf32> -> vector<64x256xf32>
    %c0_5 = arith.constant 0 : index
    %c0_6 = arith.constant 0 : index
    %7 = vector.load %arg4[%c0_5, %c0_6] : memref<1x256xf32, #tpu.memory_space<vmem>>, vector<1x256xf32>
    %8 = vector.broadcast %7 : vector<1x256xf32> to vector<64x256xf32>
    %9 = arith.addf %6, %8 : vector<64x256xf32>
    %cst_7 = arith.constant 9.99999997E-7 : f32
    %10 = vector.broadcast %cst_7 : f32 to vector<64x256xf32>
    %11 = arith.maximumf %9, %10 : vector<64x256xf32>
    %12 = arith.mulf %11, %11 : vector<64x256xf32>
    %13 = arith.mulf %12, %11 : vector<64x256xf32>
    %cst_8 = arith.constant 1.000000e+00 : f32
    %14 = vector.broadcast %cst_8 : f32 to vector<1x64xf32>
    %c0_9 = arith.constant 0 : index
    %c0_10 = arith.constant 0 : index
    %15 = vector.load %arg11[%c0_9, %c0_10] : memref<1x256xf32, #tpu.memory_space<vmem>>, vector<1x256xf32>
    %cst_11 = arith.constant dense<0.000000e+00> : vector<1x256xf32>
    %16 = tpu.matmul %14, %13, %cst_11 {dimension_numbers = #tpu.dot_dimension_numbers<[1], [0], [0], [1], [0, 0, 1, 1], [], []>} : vector<1x64xf32>, vector<64x256xf32>, vector<1x256xf32> -> vector<1x256xf32>
    %17 = arith.addf %15, %16 : vector<1x256xf32>
    %c0_12 = arith.constant 0 : index
    %c0_13 = arith.constant 0 : index
    %18 = vector.load %arg11[%c0_12, %c0_13] : memref<1x256xf32, #tpu.memory_space<vmem>>, vector<1x256xf32>
    tpu.vector_store %arg11[%c0_12, %c0_13], %17 {strides = array<i32>} : memref<1x256xf32, #tpu.memory_space<vmem>>, vector<1x256xf32>,
    %c0_i32_14 = arith.constant 0 : i32
    %19 = arith.cmpi eq, %arg1, %c0_i32_14 : i32
    %20 = arith.extui %19 : i1 to i32
    %c0_i32_15 = arith.constant 0 : i32
    %21 = arith.cmpi ne, %20, %c0_i32_15 : i32
    scf.if %21 {
      %c0_16 = arith.constant 0 : index
      %c0_17 = arith.constant 0 : index
      %22 = vector.load %arg11[%c0_16, %c0_17] : memref<1x256xf32, #tpu.memory_space<vmem>>, vector<1x256xf32>
      %cst_18 = arith.constant 1.562500e-02 : f32
      %23 = vector.broadcast %cst_18 : f32 to vector<1x256xf32>
      %24 = arith.mulf %22, %23 : vector<1x256xf32>
      %cst_19 = arith.constant 0.333333343 : f32
      %25 = vector.broadcast %cst_19 : f32 to vector<1x256xf32>
      %26 = math.powf %24, %25 : vector<1x256xf32>
      %27 = vector.extract_strided_slice %26 {offsets = [0, 0], sizes = [1, 64], strides = [1, 1]} : vector<1x256xf32> to vector<1x64xf32>
      %c0_20 = arith.constant 0 : index
      %c0_21 = arith.constant 0 : index
      %28 = vector.load %arg5[%c0_20, %c0_21] : memref<64x32xf32, #tpu.memory_space<vmem>>, vector<64x32xf32>
      %cst_22 = arith.constant dense<0.000000e+00> : vector<1x32xf32>
      %29 = tpu.matmul %27, %28, %cst_22 {dimension_numbers = #tpu.dot_dimension_numbers<[1], [0], [0], [1], [0, 0, 1, 1], [], []>} : vector<1x64xf32>, vector<64x32xf32>, vector<1x32xf32> -> vector<1x32xf32>
      %c0_23 = arith.constant 0 : index
      %c0_24 = arith.constant 0 : index
      %30 = vector.load %arg6[%c0_23, %c0_24] : memref<1x32xf32, #tpu.memory_space<vmem>>, vector<1x32xf32>
      %31 = arith.addf %29, %30 : vector<1x32xf32>
      %c0_25 = arith.constant 0 : index
      %c0_26 = arith.constant 0 : index
      %c0_27 = arith.constant 0 : index
      %32 = vector.load %arg9[%c0_25, %c0_26, %c0_27] : memref<1x1x32xf32, #tpu.memory_space<vmem>>, vector<1x1x32xf32>
      %33 = vector.shape_cast %32 : vector<1x1x32xf32> to vector<1x32xf32>
      %34 = vector.shape_cast %31 : vector<1x32xf32> to vector<1x1x32xf32>
      tpu.vector_store %arg9[%c0_25, %c0_26, %c0_27], %34 {strides = array<i32>} : memref<1x1x32xf32, #tpu.memory_space<vmem>>, vector<1x1x32xf32>,
      %35 = vector.extract_strided_slice %26 {offsets = [0, 64], sizes = [1, 64], strides = [1, 1]} : vector<1x256xf32> to vector<1x64xf32>
      %36 = arith.mulf %35, %35 : vector<1x64xf32>
      %cst_28 = arith.constant dense<0.000000e+00> : vector<1xf32>
      %37 = vector.multi_reduction <add>, %36, %cst_28 [1] : vector<1x64xf32> to vector<1xf32>
      %38 = vector.shape_cast %37 : vector<1xf32> to vector<1x1xf32>
      %cst_29 = arith.constant 1.000000e-24 : f32
      %39 = vector.broadcast %cst_29 : f32 to vector<1x1xf32>
      %40 = arith.maximumf %38, %39 : vector<1x1xf32>
      %41 = math.rsqrt %40 : vector<1x1xf32>
      %42 = vector.broadcast %41 : vector<1x1xf32> to vector<1x64xf32>
      %43 = arith.mulf %35, %42 : vector<1x64xf32>
      %c0_30 = arith.constant 0 : index
      %c0_31 = arith.constant 0 : index
      %c0_32 = arith.constant 0 : index
      %44 = vector.load %arg7[%c0_30, %c0_31, %c0_32] : memref<2x1x64xf32, #tpu.memory_space<vmem>>, vector<1x1x64xf32>
      %45 = vector.shape_cast %44 : vector<1x1x64xf32> to vector<1x64xf32>
      %46 = arith.subf %43, %45 : vector<1x64xf32>
      %c0_33 = arith.constant 0 : index
      %c0_34 = arith.constant 0 : index
      %c0_35 = arith.constant 0 : index
      %47 = vector.load %arg8[%c0_33, %c0_34, %c0_35] : memref<2x64x32xf32, #tpu.memory_space<vmem>>, vector<1x64x32xf32>
      %48 = vector.shape_cast %47 : vector<1x64x32xf32> to vector<64x32xf32>
      %cst_36 = arith.constant dense<0.000000e+00> : vector<1x32xf32>
      %49 = tpu.matmul %46, %48, %cst_36 {dimension_numbers = #tpu.dot_dimension_numbers<[1], [0], [0], [1], [0, 0, 1, 1], [], []>} : vector<1x64xf32>, vector<64x32xf32>, vector<1x32xf32> -> vector<1x32xf32>
      %50 = arith.mulf %49, %49 : vector<1x32xf32>
      %cst_37 = arith.constant dense<0.000000e+00> : vector<1xf32>
      %51 = vector.multi_reduction <add>, %50, %cst_37 [1] : vector<1x32xf32> to vector<1xf32>
      %52 = vector.shape_cast %51 : vector<1xf32> to vector<1x1xf32>
      %cst_38 = arith.constant 1.000000e-24 : f32
      %53 = vector.broadcast %cst_38 : f32 to vector<1x1xf32>
      %54 = arith.maximumf %52, %53 : vector<1x1xf32>
      %55 = math.rsqrt %54 : vector<1x1xf32>
      %56 = vector.broadcast %55 : vector<1x1xf32> to vector<1x32xf32>
      %57 = arith.mulf %49, %56 : vector<1x32xf32>
      %c0_39 = arith.constant 0 : index
      %c0_40 = arith.constant 0 : index
      %c0_41 = arith.constant 0 : index
      %58 = vector.load %arg10[%c0_39, %c0_40, %c0_41] : memref<1x2x32xf32, #tpu.memory_space<vmem>>, vector<1x1x32xf32>
      %59 = vector.shape_cast %58 : vector<1x1x32xf32> to vector<1x32xf32>
      %60 = vector.shape_cast %57 : vector<1x32xf32> to vector<1x1x32xf32>
      tpu.vector_store %arg10[%c0_39, %c0_40, %c0_41], %60 {strides = array<i32>} : memref<1x2x32xf32, #tpu.memory_space<vmem>>, vector<1x1x32xf32>,
      %61 = vector.extract_strided_slice %26 {offsets = [0, 128], sizes = [1, 64], strides = [1, 1]} : vector<1x256xf32> to vector<1x64xf32>
      %62 = arith.mulf %61, %61 : vector<1x64xf32>
      %cst_42 = arith.constant dense<0.000000e+00> : vector<1xf32>
      %63 = vector.multi_reduction <add>, %62, %cst_42 [1] : vector<1x64xf32> to vector<1xf32>
      %64 = vector.shape_cast %63 : vector<1xf32> to vector<1x1xf32>
      %cst_43 = arith.constant 1.000000e-24 : f32
      %65 = vector.broadcast %cst_43 : f32 to vector<1x1xf32>
      %66 = arith.maximumf %64, %65 : vector<1x1xf32>
      %67 = math.rsqrt %66 : vector<1x1xf32>
      %68 = vector.broadcast %67 : vector<1x1xf32> to vector<1x64xf32>
      %69 = arith.mulf %61, %68 : vector<1x64xf32>
      %c1 = arith.constant 1 : index
      %c0_44 = arith.constant 0 : index
      %c0_45 = arith.constant 0 : index
      %70 = vector.load %arg7[%c1, %c0_44, %c0_45] : memref<2x1x64xf32, #tpu.memory_space<vmem>>, vector<1x1x64xf32>
      %71 = vector.shape_cast %70 : vector<1x1x64xf32> to vector<1x64xf32>
      %72 = arith.subf %69, %71 : vector<1x64xf32>
      %c1_46 = arith.constant 1 : index
      %c0_47 = arith.constant 0 : index
      %c0_48 = arith.constant 0 : index
      %73 = vector.load %arg8[%c1_46, %c0_47, %c0_48] : memref<2x64x32xf32, #tpu.memory_space<vmem>>, vector<1x64x32xf32>
      %74 = vector.shape_cast %73 : vector<1x64x32xf32> to vector<64x32xf32>
      %cst_49 = arith.constant dense<0.000000e+00> : vector<1x32xf32>
      %75 = tpu.matmul %72, %74, %cst_49 {dimension_numbers = #tpu.dot_dimension_numbers<[1], [0], [0], [1], [0, 0, 1, 1], [], []>} : vector<1x64xf32>, vector<64x32xf32>, vector<1x32xf32> -> vector<1x32xf32>
      %76 = arith.mulf %75, %75 : vector<1x32xf32>
      %cst_50 = arith.constant dense<0.000000e+00> : vector<1xf32>
      %77 = vector.multi_reduction <add>, %76, %cst_50 [1] : vector<1x32xf32> to vector<1xf32>
      %78 = vector.shape_cast %77 : vector<1xf32> to vector<1x1xf32>
      %cst_51 = arith.constant 1.000000e-24 : f32
      %79 = vector.broadcast %cst_51 : f32 to vector<1x1xf32>
      %80 = arith.maximumf %78, %79 : vector<1x1xf32>
      %81 = math.rsqrt %80 : vector<1x1xf32>
      %82 = vector.broadcast %81 : vector<1x1xf32> to vector<1x32xf32>
      %83 = arith.mulf %75, %82 : vector<1x32xf32>
      %c0_52 = arith.constant 0 : index
      %c1_53 = arith.constant 1 : index
      %c0_54 = arith.constant 0 : index
      %84 = vector.load %arg10[%c0_52, %c1_53, %c0_54] : memref<1x2x32xf32, #tpu.memory_space<vmem>>, vector<1x1x32xf32>
      %85 = vector.shape_cast %84 : vector<1x1x32xf32> to vector<1x32xf32>
      %86 = vector.shape_cast %83 : vector<1x32xf32> to vector<1x1x32xf32>
      tpu.vector_store %arg10[%c0_52, %c1_53, %c0_54], %86 {strides = array<i32>} : memref<1x2x32xf32, #tpu.memory_space<vmem>>, vector<1x1x32xf32>,
    } else {
    }
    return
  }
  func.func @transform_0(%arg0: i32, %arg1: i32) -> (i32, i32, i32) {
    %c0_i32 = arith.constant 0 : i32
    %c0_i32_0 = arith.constant 0 : i32
    return %arg0, %arg1, %c0_i32 : i32, i32, i32
  }
  func.func @transform_1(%arg0: i32, %arg1: i32) -> (i32, i32) {
    %c0_i32 = arith.constant 0 : i32
    %c0_i32_0 = arith.constant 0 : i32
    %c0_i32_1 = arith.constant 0 : i32
    return %c0_i32, %c0_i32_0 : i32, i32
  }
  func.func @transform_2(%arg0: i32, %arg1: i32) -> (i32, i32) {
    %c0_i32 = arith.constant 0 : i32
    %c0_i32_0 = arith.constant 0 : i32
    %c0_i32_1 = arith.constant 0 : i32
    return %c0_i32, %c0_i32_0 : i32, i32
  }
  func.func @transform_3(%arg0: i32, %arg1: i32) -> (i32, i32) {
    %c0_i32 = arith.constant 0 : i32
    %c0_i32_0 = arith.constant 0 : i32
    %c0_i32_1 = arith.constant 0 : i32
    return %c0_i32, %c0_i32_0 : i32, i32
  }
  func.func @transform_4(%arg0: i32, %arg1: i32) -> (i32, i32) {
    %c0_i32 = arith.constant 0 : i32
    %c0_i32_0 = arith.constant 0 : i32
    %c0_i32_1 = arith.constant 0 : i32
    return %c0_i32, %c0_i32_0 : i32, i32
  }
  func.func @transform_5(%arg0: i32, %arg1: i32) -> (i32, i32, i32) {
    %c0_i32 = arith.constant 0 : i32
    %c0_i32_0 = arith.constant 0 : i32
    %c0_i32_1 = arith.constant 0 : i32
    %c0_i32_2 = arith.constant 0 : i32
    return %c0_i32, %c0_i32_0, %c0_i32_1 : i32, i32, i32
  }
  func.func @transform_6(%arg0: i32, %arg1: i32) -> (i32, i32, i32) {
    %c0_i32 = arith.constant 0 : i32
    %c0_i32_0 = arith.constant 0 : i32
    %c0_i32_1 = arith.constant 0 : i32
    %c0_i32_2 = arith.constant 0 : i32
    return %c0_i32, %c0_i32_0, %c0_i32_1 : i32, i32, i32
  }
  func.func @transform_7(%arg0: i32, %arg1: i32) -> (i32, i32, i32) {
    %c0_i32 = arith.constant 0 : i32
    %c0_i32_0 = arith.constant 0 : i32
    %c0_i32_1 = arith.constant 0 : i32
    return %arg0, %c0_i32, %c0_i32_0 : i32, i32, i32
  }
  func.func @transform_8(%arg0: i32, %arg1: i32) -> (i32, i32, i32) {
    %c0_i32 = arith.constant 0 : i32
    %c0_i32_0 = arith.constant 0 : i32
    %c0_i32_1 = arith.constant 0 : i32
    return %arg0, %c0_i32, %c0_i32_0 : i32, i32, i32
  }
}

</mosaic_0001>

<bundles_post_ra>
// kernel: multi_teacher_distill_forward.2
= control target key start
LH: loop header
LB: loop body
LE: loop exit
PB: predicated region body
PF: predicated region fallthrough
CT: control target
= control target key end

     0   :  { %s1380_s12 = smov 0   ;;  %s1579_s0 = inlined_call_operand.vmem [shape: bf16[1024,32], index: 0, kind: input, shape index: {}]   ;;  %s1580_s1 = inlined_call_operand.vmem [shape: bf16[32,128], index: 1, kind: input, shape index: {}]   ;;  %s1581_s2 = inlined_call_operand.vmem [shape: f32[1,128], index: 2, kind: input, shape index: {}]   ;;  %s1582_s3 = inlined_call_operand.vmem [shape: bf16[1024,128], index: 3, kind: output, shape index: {}]  }
   0x1 LB: > { %s933_s13 = sadd.s32 4294967295, %s1358_s12   ;;  %p937_p0 = scmp.ge.s32.totalorder %s1358_s12, 1  ;;  %s1358_s12 = sphi %s1380_s12, %s13_s12  }
   0x2   : > { %p138_p1 = scmp.lt.s32.totalorder %s1358_s12, 3 }
   0x4   : > { %p139_p2 = pnand %p937_p0, %p138_p1 }
   0x5   : > { %s938_s16 = sshll.u32 (!%p139_p2), %s933_s13, 6 }
   0x6   : > { %142 = sbr.rel (%p139_p2) target bundleno = 280 (0x118), region = 32  ;;  %p163_p3 = scmp.lt.s32.totalorder (!%p139_p2), %s938_s16, 127 }
   0xb   : > { %v1145_v0 = vld [vmem:[%s1580_s1 + $0x8] sm:$0xff]  ;;  %v1144_v1 = vld [vmem:[%s1580_s1] sm:$0xff]  ;;  %s1584_s16 = smov (!%p163_p3, %s938_s16), 127  ;;  %vm419_vm0 = vcmask 261120  }
   0xc   : > { %522 = vmatpush.bf16.msra.mxu0 %v1145_v0  ;;  %1337 = vmatpush.bf16.msra.mxu1 %v1145_v0  ;;  %s939_s19 = sshll.u32 %s1584_s16, 2  ;;  %v1471_v36 = vld [vmem:[%s1581_s2] ss:$0 sm:$0xff] }
   0xd   : > { %1338 = vmatpush.bf16.msra.mxu2 %v1145_v0  ;;  %1339 = vmatpush.bf16.msra.mxu3 %v1145_v0  ;;  %s1402_s22 = scalar_lea.vmem %s1579_s0, %s939_s19  ;;  %s1482_s27 = scalar_lea.vmem %s1582_s3, %s939_s19 }
   0xe   : > { %v1112_v2 = vld [vmem:[%s1402_s22] sm:$0xff]  ;;  %v1113_v6 = vld [vmem:[%s1402_s22 + $0x8] sm:$0xff]  ;;  %v1114_v10 = vld [vmem:[%s1402_s22 + $0x10] sm:$0xff] }
   0xf   : > { %v1120_v3 = vld [vmem:[%s1402_s22 + $0x40] sm:$0xff]  ;;  %v1121_v7 = vld [vmem:[%s1402_s22 + $0x48] sm:$0xff]  ;;  %v1122_v11 = vld [vmem:[%s1402_s22 + $0x50] sm:$0xff] }
  0x10   : > { %523 = vmatpush.bf16.msra.mxu0 %v1144_v1  ;;  %1340 = vmatpush.bf16.msra.mxu1 %v1144_v1  ;;  %v1128_v4 = vld [vmem:[%s1402_s22 + $0x80] sm:$0xff]  ;;  %v1129_v8 = vld [vmem:[%s1402_s22 + $0x88] sm:$0xff]  ;;  %v1130_v12 = vld [vmem:[%s1402_s22 + $0x90] sm:$0xff] }
  0x11   : > { %1341 = vmatpush.bf16.msra.mxu2 %v1144_v1  ;;  %1342 = vmatpush.bf16.msra.mxu3 %v1144_v1  ;;  %v1136_v5 = vld [vmem:[%s1402_s22 + $0xc0] sm:$0xff]  ;;  %v1137_v9 = vld [vmem:[%s1402_s22 + $0xc8] sm:$0xff]  ;;  %v1138_v13 = vld [vmem:[%s1402_s22 + $0xd0] sm:$0xff] }
  0x12   : > { %v1115_v14 = vld [vmem:[%s1402_s22 + $0x18] sm:$0xff]  ;;  %v1116_v18 = vld [vmem:[%s1402_s22 + $0x20] sm:$0xff]  ;;  %v1117_v22 = vld [vmem:[%s1402_s22 + $0x28] sm:$0xff] }
  0x13   : > { %1078 = vmatmul.msk.bf16.vlgmr.msra.gmra.mxu0 %vm419_vm0, %v1112_v2  ;;  %1086 = vmatmul.msk.bf16.vlgmr.msra.gmra.mxu1 %vm419_vm0, %v1120_v3  ;;  %v1123_v15 = vld [vmem:[%s1402_s22 + $0x58] sm:$0xff]  ;;  %v1124_v19 = vld [vmem:[%s1402_s22 + $0x60] sm:$0xff]  ;;  %v1125_v23 = vld [vmem:[%s1402_s22 + $0x68] sm:$0xff] }
  0x14   : > { %1094 = vmatmul.msk.bf16.vlgmr.msra.gmra.mxu2 %vm419_vm0, %v1128_v4  ;;  %1102 = vmatmul.msk.bf16.vlgmr.msra.gmra.mxu3 %vm419_vm0, %v1136_v5  ;;  %v1131_v16 = vld [vmem:[%s1402_s22 + $0x98] sm:$0xff]  ;;  %v1132_v20 = vld [vmem:[%s1402_s22 + $0xa0] sm:$0xff]  ;;  %v1133_v24 = vld [vmem:[%s1402_s22 + $0xa8] sm:$0xff] }
  0x15   : > { %v1139_v17 = vld [vmem:[%s1402_s22 + $0xd8] sm:$0xff]  ;;  %v1140_v21 = vld [vmem:[%s1402_s22 + $0xe0] sm:$0xff]  ;;  %v1141_v25 = vld [vmem:[%s1402_s22 + $0xe8] sm:$0xff] }
  0x16   : > { %v1118_v26 = vld [vmem:[%s1402_s22 + $0x30] sm:$0xff]  ;;  %v1119_v30 = vld [vmem:[%s1402_s22 + $0x38] sm:$0xff] }
  0x17   : > { %v1126_v27 = vld [vmem:[%s1402_s22 + $0x70] sm:$0xff]  ;;  %v1127_v31 = vld [vmem:[%s1402_s22 + $0x78] sm:$0xff] }
  0x18   : > { %v1134_v28 = vld [vmem:[%s1402_s22 + $0xb0] sm:$0xff]  ;;  %v1135_v32 = vld [vmem:[%s1402_s22 + $0xb8] sm:$0xff] }
  0x19   : > { %v1142_v29 = vld [vmem:[%s1402_s22 + $0xf0] sm:$0xff]  ;;  %v1143_v33 = vld [vmem:[%s1402_s22 + $0xf8] sm:$0xff] }
  0x23   : > { %1079 = vmatmul.msk.bf16.gmra.mxu0 %vm419_vm0, %v1113_v6  ;;  %1087 = vmatmul.msk.bf16.gmra.mxu1 %vm419_vm0, %v1121_v7 }
  0x24   : > { %1095 = vmatmul.msk.bf16.gmra.mxu2 %vm419_vm0, %v1129_v8  ;;  %1103 = vmatmul.msk.bf16.gmra.mxu3 %vm419_vm0, %v1137_v9 }
  0x33   : > { %1080 = vmatmul.msk.bf16.gmra.mxu0 %vm419_vm0, %v1114_v10  ;;  %1088 = vmatmul.msk.bf16.gmra.mxu1 %vm419_vm0, %v1122_v11 }
  0x34   : > { %1096 = vmatmul.msk.bf16.gmra.mxu2 %vm419_vm0, %v1130_v12  ;;  %1104 = vmatmul.msk.bf16.gmra.mxu3 %vm419_vm0, %v1138_v13 }
  0x43   : > { %1081 = vmatmul.msk.bf16.gmra.mxu0 %vm419_vm0, %v1115_v14  ;;  %1089 = vmatmul.msk.bf16.gmra.mxu1 %vm419_vm0, %v1123_v15 }
  0x44   : > { %1097 = vmatmul.msk.bf16.gmra.mxu2 %vm419_vm0, %v1131_v16  ;;  %1105 = vmatmul.msk.bf16.gmra.mxu3 %vm419_vm0, %v1139_v17 }
  0x53   : > { %1082 = vmatmul.msk.bf16.gmra.mxu0 %vm419_vm0, %v1116_v18  ;;  %1090 = vmatmul.msk.bf16.gmra.mxu1 %vm419_vm0, %v1124_v19 }
  0x54   : > { %1098 = vmatmul.msk.bf16.gmra.mxu2 %vm419_vm0, %v1132_v20  ;;  %1106 = vmatmul.msk.bf16.gmra.mxu3 %vm419_vm0, %v1140_v21 }
  0x63   : > { %1083 = vmatmul.msk.bf16.gmra.mxu0 %vm419_vm0, %v1117_v22  ;;  %1091 = vmatmul.msk.bf16.gmra.mxu1 %vm419_vm0, %v1125_v23 }
  0x64   : > { %1099 = vmatmul.msk.bf16.gmra.mxu2 %vm419_vm0, %v1133_v24  ;;  %1107 = vmatmul.msk.bf16.gmra.mxu3 %vm419_vm0, %v1141_v25 }
  0x73   : > { %1084 = vmatmul.msk.bf16.gmra.mxu0 %vm419_vm0, %v1118_v26  ;;  %1092 = vmatmul.msk.bf16.gmra.mxu1 %vm419_vm0, %v1126_v27 }
  0x74   : > { %1100 = vmatmul.msk.bf16.gmra.mxu2 %vm419_vm0, %v1134_v28  ;;  %1108 = vmatmul.msk.bf16.gmra.mxu3 %vm419_vm0, %v1142_v29 }
  0x83   : > { %1085 = vmatmul.msk.bf16.gmra.mxu0 %vm419_vm0, %v1119_v30  ;;  %1093 = vmatmul.msk.bf16.gmra.mxu1 %vm419_vm0, %v1127_v31 }
  0x84   : > { %1101 = vmatmul.msk.bf16.gmra.mxu2 %vm419_vm0, %v1135_v32  ;;  %1109 = vmatmul.msk.bf16.gmra.mxu3 %vm419_vm0, %v1143_v33 }
  0x90   : > { %v525_v34 = vpop.f32.mrf.mxu0  ;;  %v565_v35 = vpop.f32.mrf.mxu1 }
  0x91   : > { %v526_v37 = vadd.f32 %v1471_v36, %v525_v34  ;;  %v566_v38 = vadd.f32 %v1471_v36, %v565_v35 }
  0x93   : > { %v685_v45 = vmax.f32 %v526_v37, 0.0  ;;  %v701_v46 = vmax.f32 %v566_v38, 0.0 }
  0x97   : > { %v605_v39 = vpop.f32.mrf.mxu2  ;;  %v645_v40 = vpop.f32.mrf.mxu3 }
  0x98   : > { %v527_v41 = vpop.f32.mrf.mxu0  ;;  %v567_v42 = vpop.f32.mrf.mxu1  ;;  %v606_v51 = vadd.f32 %v1471_v36, %v605_v39  ;;  %v646_v52 = vadd.f32 %v1471_v36, %v645_v40 }
  0x99   : > { %v528_v43 = vadd.f32 %v1471_v36, %v527_v41  ;;  %v568_v44 = vadd.f32 %v1471_v36, %v567_v42 }
  0x9a   : > { %v717_v59 = vmax.f32 %v606_v51, 0.0  ;;  %v733_v60 = vmax.f32 %v646_v52, 0.0 }
  0x9b   : > { %v686_v47 = vmax.f32 %v528_v43, 0.0  ;;  %v702_v48 = vmax.f32 %v568_v44, 0.0 }
  0x9d   : > { %v1149_v49 = vpack.c.bf16 %v686_v47, %v685_v45  ;;  %v1189_v50 = vpack.c.bf16 %v702_v48, %v701_v46 }
  0x9f   : > { %1150 = vst [vmem:[%s1482_s27] sm:$0xff] %v1149_v49   ;;  %v607_v53 = vpop.f32.mrf.mxu2  ;;  %v647_v54 = vpop.f32.mrf.mxu3 }
  0xa0   : > { %1313 = vst [vmem:[%s1482_s27 + $0x40] sm:$0xff] %v1189_v50   ;;  %v608_v55 = vadd.f32 %v1471_v36, %v607_v53  ;;  %v648_v56 = vadd.f32 %v1471_v36, %v647_v54  ;;  %v530_v57 = vpop.f32.mrf.mxu0  ;;  %v570_v58 = vpop.f32.mrf.mxu1 }
  0xa1   : > { %v531_v1 = vadd.f32 %v1471_v36, %v530_v57  ;;  %v571_v2 = vadd.f32 %v1471_v36, %v570_v58 }
  0xa2   : > { %v718_v61 = vmax.f32 %v608_v55, 0.0  ;;  %v734_v62 = vmax.f32 %v648_v56, 0.0 }
  0xa3   : > { %v687_v9 = vmax.f32 %v531_v1, 0.0  ;;  %v703_v10 = vmax.f32 %v571_v2, 0.0 }
  0xa4   : > { %v1229_v63 = vpack.c.bf16 %v718_v61, %v717_v59  ;;  %v1269_v0 = vpack.c.bf16 %v734_v62, %v733_v60 }
  0xa6   : > { %1321 = vst [vmem:[%s1482_s27 + $0x80] sm:$0xff] %v1229_v63  }
  0xa7   : > { %1329 = vst [vmem:[%s1482_s27 + $0xc0] sm:$0xff] %v1269_v0   ;;  %v610_v3 = vpop.f32.mrf.mxu2  ;;  %v650_v4 = vpop.f32.mrf.mxu3 }
  0xa8   : > { %v532_v5 = vpop.f32.mrf.mxu0  ;;  %v572_v6 = vpop.f32.mrf.mxu1  ;;  %v611_v15 = vadd.f32 %v1471_v36, %v610_v3  ;;  %v651_v16 = vadd.f32 %v1471_v36, %v650_v4 }
  0xa9   : > { %v533_v7 = vadd.f32 %v1471_v36, %v532_v5  ;;  %v573_v8 = vadd.f32 %v1471_v36, %v572_v6 }
  0xaa   : > { %v719_v23 = vmax.f32 %v611_v15, 0.0  ;;  %v735_v24 = vmax.f32 %v651_v16, 0.0 }
  0xab   : > { %v688_v11 = vmax.f32 %v533_v7, 0.0  ;;  %v704_v12 = vmax.f32 %v573_v8, 0.0 }
  0xad   : > { %v1154_v13 = vpack.c.bf16 %v688_v11, %v687_v9  ;;  %v1194_v14 = vpack.c.bf16 %v704_v12, %v703_v10 }
  0xaf   : > { %1306 = vst [vmem:[%s1482_s27 + $0x8] sm:$0xff] %v1154_v13   ;;  %v612_v17 = vpop.f32.mrf.mxu2  ;;  %v652_v18 = vpop.f32.mrf.mxu3 }
  0xb0   : > { %1314 = vst [vmem:[%s1482_s27 + $0x48] sm:$0xff] %v1194_v14   ;;  %v613_v19 = vadd.f32 %v1471_v36, %v612_v17  ;;  %v653_v20 = vadd.f32 %v1471_v36, %v652_v18  ;;  %v535_v21 = vpop.f32.mrf.mxu0  ;;  %v575_v22 = vpop.f32.mrf.mxu1 }
  0xb1   : > { %v536_v29 = vadd.f32 %v1471_v36, %v535_v21  ;;  %v576_v30 = vadd.f32 %v1471_v36, %v575_v22 }
  0xb2   : > { %v720_v25 = vmax.f32 %v613_v19, 0.0  ;;  %v736_v26 = vmax.f32 %v653_v20, 0.0 }
  0xb3   : > { %v689_v38 = vmax.f32 %v536_v29, 0.0  ;;  %v705_v39 = vmax.f32 %v576_v30, 0.0 }
  0xb4   : > { %v1234_v27 = vpack.c.bf16 %v720_v25, %v719_v23  ;;  %v1274_v28 = vpack.c.bf16 %v736_v26, %v735_v24 }
  0xb6   : > { %1322 = vst [vmem:[%s1482_s27 + $0x88] sm:$0xff] %v1234_v27  }
  0xb7   : > { %1330 = vst [vmem:[%s1482_s27 + $0xc8] sm:$0xff] %v1274_v28   ;;  %v615_v31 = vpop.f32.mrf.mxu2  ;;  %v655_v32 = vpop.f32.mrf.mxu3 }
  0xb8   : > { %v537_v33 = vpop.f32.mrf.mxu0  ;;  %v577_v34 = vpop.f32.mrf.mxu1  ;;  %v616_v44 = vadd.f32 %v1471_v36, %v615_v31  ;;  %v656_v45 = vadd.f32 %v1471_v36, %v655_v32 }
  0xb9   : > { %v538_v35 = vadd.f32 %v1471_v36, %v537_v33  ;;  %v578_v37 = vadd.f32 %v1471_v36, %v577_v34 }
  0xba   : > { %v721_v52 = vmax.f32 %v616_v44, 0.0  ;;  %v737_v53 = vmax.f32 %v656_v45, 0.0 }
  0xbb   : > { %v690_v40 = vmax.f32 %v538_v35, 0.0  ;;  %v706_v41 = vmax.f32 %v578_v37, 0.0 }
  0xbd   : > { %v1159_v42 = vpack.c.bf16 %v690_v40, %v689_v38  ;;  %v1199_v43 = vpack.c.bf16 %v706_v41, %v705_v39 }
  0xbf   : > { %1307 = vst [vmem:[%s1482_s27 + $0x10] sm:$0xff] %v1159_v42   ;;  %v617_v46 = vpop.f32.mrf.mxu2  ;;  %v657_v47 = vpop.f32.mrf.mxu3 }
  0xc0   : > { %1315 = vst [vmem:[%s1482_s27 + $0x50] sm:$0xff] %v1199_v43   ;;  %v618_v48 = vadd.f32 %v1471_v36, %v617_v46  ;;  %v658_v49 = vadd.f32 %v1471_v36, %v657_v47  ;;  %v540_v50 = vpop.f32.mrf.mxu0  ;;  %v580_v51 = vpop.f32.mrf.mxu1 }
  0xc1   : > { %v541_v58 = vadd.f32 %v1471_v36, %v540_v50  ;;  %v581_v59 = vadd.f32 %v1471_v36, %v580_v51 }
  0xc2   : > { %v722_v54 = vmax.f32 %v618_v48, 0.0  ;;  %v738_v55 = vmax.f32 %v658_v49, 0.0 }
  0xc3   : > { %v691_v2 = vmax.f32 %v541_v58, 0.0  ;;  %v707_v3 = vmax.f32 %v581_v59, 0.0 }
  0xc4   : > { %v1239_v56 = vpack.c.bf16 %v722_v54, %v721_v52  ;;  %v1279_v57 = vpack.c.bf16 %v738_v55, %v737_v53 }
  0xc6   : > { %1323 = vst [vmem:[%s1482_s27 + $0x90] sm:$0xff] %v1239_v56  }
  0xc7   : > { %1331 = vst [vmem:[%s1482_s27 + $0xd0] sm:$0xff] %v1279_v57   ;;  %v620_v60 = vpop.f32.mrf.mxu2  ;;  %v660_v61 = vpop.f32.mrf.mxu3 }
  0xc8   : > { %v542_v62 = vpop.f32.mrf.mxu0  ;;  %v582_v63 = vpop.f32.mrf.mxu1  ;;  %v621_v8 = vadd.f32 %v1471_v36, %v620_v60  ;;  %v661_v9 = vadd.f32 %v1471_v36, %v660_v61 }
  0xc9   : > { %v543_v0 = vadd.f32 %v1471_v36, %v542_v62  ;;  %v583_v1 = vadd.f32 %v1471_v36, %v582_v63 }
  0xca   : > { %v723_v16 = vmax.f32 %v621_v8, 0.0  ;;  %v739_v17 = vmax.f32 %v661_v9, 0.0 }
  0xcb   : > { %v692_v4 = vmax.f32 %v543_v0, 0.0  ;;  %v708_v5 = vmax.f32 %v583_v1, 0.0 }
  0xcd   : > { %v1164_v6 = vpack.c.bf16 %v692_v4, %v691_v2  ;;  %v1204_v7 = vpack.c.bf16 %v708_v5, %v707_v3 }
  0xcf   : > { %1308 = vst [vmem:[%s1482_s27 + $0x18] sm:$0xff] %v1164_v6   ;;  %v622_v10 = vpop.f32.mrf.mxu2  ;;  %v662_v11 = vpop.f32.mrf.mxu3 }
  0xd0   : > { %1316 = vst [vmem:[%s1482_s27 + $0x58] sm:$0xff] %v1204_v7   ;;  %v623_v12 = vadd.f32 %v1471_v36, %v622_v10  ;;  %v663_v13 = vadd.f32 %v1471_v36, %v662_v11  ;;  %v545_v14 = vpop.f32.mrf.mxu0  ;;  %v585_v15 = vpop.f32.mrf.mxu1 }
  0xd1   : > { %v546_v22 = vadd.f32 %v1471_v36, %v545_v14  ;;  %v586_v23 = vadd.f32 %v1471_v36, %v585_v15 }
  0xd2   : > { %v724_v18 = vmax.f32 %v623_v12, 0.0  ;;  %v740_v19 = vmax.f32 %v663_v13, 0.0 }
  0xd3   : > { %v693_v30 = vmax.f32 %v546_v22, 0.0  ;;  %v709_v31 = vmax.f32 %v586_v23, 0.0 }
  0xd4   : > { %v1244_v20 = vpack.c.bf16 %v724_v18, %v723_v16  ;;  %v1284_v21 = vpack.c.bf16 %v740_v19, %v739_v17 }
  0xd6   : > { %1324 = vst [vmem:[%s1482_s27 + $0x98] sm:$0xff] %v1244_v20  }
  0xd7   : > { %1332 = vst [vmem:[%s1482_s27 + $0xd8] sm:$0xff] %v1284_v21   ;;  %v625_v24 = vpop.f32.mrf.mxu2  ;;  %v665_v25 = vpop.f32.mrf.mxu3 }
  0xd8   : > { %v547_v26 = vpop.f32.mrf.mxu0  ;;  %v587_v27 = vpop.f32.mrf.mxu1  ;;  %v626_v37 = vadd.f32 %v1471_v36, %v625_v24  ;;  %v666_v38 = vadd.f32 %v1471_v36, %v665_v25 }
  0xd9   : > { %v548_v28 = vadd.f32 %v1471_v36, %v547_v26  ;;  %v588_v29 = vadd.f32 %v1471_v36, %v587_v27 }
  0xda   : > { %v725_v45 = vmax.f32 %v626_v37, 0.0  ;;  %v741_v46 = vmax.f32 %v666_v38, 0.0 }
  0xdb   : > { %v694_v32 = vmax.f32 %v548_v28, 0.0  ;;  %v710_v33 = vmax.f32 %v588_v29, 0.0 }
  0xdd   : > { %v1169_v34 = vpack.c.bf16 %v694_v32, %v693_v30  ;;  %v1209_v35 = vpack.c.bf16 %v710_v33, %v709_v31 }
  0xdf   : > { %1309 = vst [vmem:[%s1482_s27 + $0x20] sm:$0xff] %v1169_v34   ;;  %v627_v39 = vpop.f32.mrf.mxu2  ;;  %v667_v40 = vpop.f32.mrf.mxu3 }
  0xe0   : > { %1317 = vst [vmem:[%s1482_s27 + $0x60] sm:$0xff] %v1209_v35   ;;  %v628_v41 = vadd.f32 %v1471_v36, %v627_v39  ;;  %v668_v42 = vadd.f32 %v1471_v36, %v667_v40  ;;  %v550_v43 = vpop.f32.mrf.mxu0  ;;  %v590_v44 = vpop.f32.mrf.mxu1 }
  0xe1   : > { %v551_v51 = vadd.f32 %v1471_v36, %v550_v43  ;;  %v591_v52 = vadd.f32 %v1471_v36, %v590_v44 }
  0xe2   : > { %v726_v47 = vmax.f32 %v628_v41, 0.0  ;;  %v742_v48 = vmax.f32 %v668_v42, 0.0 }
  0xe3   : > { %v695_v59 = vmax.f32 %v551_v51, 0.0  ;;  %v711_v60 = vmax.f32 %v591_v52, 0.0 }
  0xe4   : > { %v1249_v49 = vpack.c.bf16 %v726_v47, %v725_v45  ;;  %v1289_v50 = vpack.c.bf16 %v742_v48, %v741_v46 }
  0xe6   : > { %1325 = vst [vmem:[%s1482_s27 + $0xa0] sm:$0xff] %v1249_v49  }
  0xe7   : > { %1333 = vst [vmem:[%s1482_s27 + $0xe0] sm:$0xff] %v1289_v50   ;;  %v630_v53 = vpop.f32.mrf.mxu2  ;;  %v670_v54 = vpop.f32.mrf.mxu3 }
  0xe8   : > { %v552_v55 = vpop.f32.mrf.mxu0  ;;  %v592_v56 = vpop.f32.mrf.mxu1  ;;  %v631_v1 = vadd.f32 %v1471_v36, %v630_v53  ;;  %v671_v2 = vadd.f32 %v1471_v36, %v670_v54 }
  0xe9   : > { %v553_v57 = vadd.f32 %v1471_v36, %v552_v55  ;;  %v593_v58 = vadd.f32 %v1471_v36, %v592_v56 }
  0xea   : > { %v727_v9 = vmax.f32 %v631_v1, 0.0  ;;  %v743_v10 = vmax.f32 %v671_v2, 0.0 }
  0xeb   : > { %v696_v61 = vmax.f32 %v553_v57, 0.0  ;;  %v712_v62 = vmax.f32 %v593_v58, 0.0 }
  0xed   : > { %v1174_v63 = vpack.c.bf16 %v696_v61, %v695_v59  ;;  %v1214_v0 = vpack.c.bf16 %v712_v62, %v711_v60 }
  0xef   : > { %1310 = vst [vmem:[%s1482_s27 + $0x28] sm:$0xff] %v1174_v63   ;;  %v632_v3 = vpop.f32.mrf.mxu2  ;;  %v672_v4 = vpop.f32.mrf.mxu3 }
  0xf0   : > { %1318 = vst [vmem:[%s1482_s27 + $0x68] sm:$0xff] %v1214_v0   ;;  %v633_v5 = vadd.f32 %v1471_v36, %v632_v3  ;;  %v673_v6 = vadd.f32 %v1471_v36, %v672_v4  ;;  %v555_v7 = vpop.f32.mrf.mxu0  ;;  %v595_v8 = vpop.f32.mrf.mxu1 }
  0xf1   : > { %v556_v15 = vadd.f32 %v1471_v36, %v555_v7  ;;  %v596_v16 = vadd.f32 %v1471_v36, %v595_v8 }
  0xf2   : > { %v728_v11 = vmax.f32 %v633_v5, 0.0  ;;  %v744_v12 = vmax.f32 %v673_v6, 0.0 }
  0xf3   : > { %v697_v23 = vmax.f32 %v556_v15, 0.0  ;;  %v713_v24 = vmax.f32 %v596_v16, 0.0 }
  0xf4   : > { %v1254_v13 = vpack.c.bf16 %v728_v11, %v727_v9  ;;  %v1294_v14 = vpack.c.bf16 %v744_v12, %v743_v10 }
  0xf6   : > { %1326 = vst [vmem:[%s1482_s27 + $0xa8] sm:$0xff] %v1254_v13  }
  0xf7   : > { %1334 = vst [vmem:[%s1482_s27 + $0xe8] sm:$0xff] %v1294_v14   ;;  %v635_v17 = vpop.f32.mrf.mxu2  ;;  %v675_v18 = vpop.f32.mrf.mxu3 }
  0xf8   : > { %v557_v19 = vpop.f32.mrf.mxu0  ;;  %v597_v20 = vpop.f32.mrf.mxu1  ;;  %v636_v29 = vadd.f32 %v1471_v36, %v635_v17  ;;  %v676_v30 = vadd.f32 %v1471_v36, %v675_v18 }
  0xf9   : > { %v558_v21 = vadd.f32 %v1471_v36, %v557_v19  ;;  %v598_v22 = vadd.f32 %v1471_v36, %v597_v20 }
  0xfa   : > { %v729_v38 = vmax.f32 %v636_v29, 0.0  ;;  %v745_v39 = vmax.f32 %v676_v30, 0.0 }
  0xfb   : > { %v698_v25 = vmax.f32 %v558_v21, 0.0  ;;  %v714_v26 = vmax.f32 %v598_v22, 0.0 }
  0xfd   : > { %v1179_v27 = vpack.c.bf16 %v698_v25, %v697_v23  ;;  %v1219_v28 = vpack.c.bf16 %v714_v26, %v713_v24 }
  0xff   : > { %1311 = vst [vmem:[%s1482_s27 + $0x30] sm:$0xff] %v1179_v27   ;;  %v637_v31 = vpop.f32.mrf.mxu2  ;;  %v677_v32 = vpop.f32.mrf.mxu3 }
 0x100   : > { %1319 = vst [vmem:[%s1482_s27 + $0x70] sm:$0xff] %v1219_v28   ;;  %v638_v33 = vadd.f32 %v1471_v36, %v637_v31  ;;  %v678_v34 = vadd.f32 %v1471_v36, %v677_v32  ;;  %v560_v35 = vpop.f32.mrf.mxu0  ;;  %v600_v37 = vpop.f32.mrf.mxu1 }
 0x101   : > { %v561_v44 = vadd.f32 %v1471_v36, %v560_v35  ;;  %v601_v45 = vadd.f32 %v1471_v36, %v600_v37 }
 0x102   : > { %v730_v40 = vmax.f32 %v638_v33, 0.0  ;;  %v746_v41 = vmax.f32 %v678_v34, 0.0 }
 0x103   : > { %v699_v52 = vmax.f32 %v561_v44, 0.0  ;;  %v715_v53 = vmax.f32 %v601_v45, 0.0 }
 0x104   : > { %v1259_v42 = vpack.c.bf16 %v730_v40, %v729_v38  ;;  %v1299_v43 = vpack.c.bf16 %v746_v41, %v745_v39 }
 0x106   : > { %1327 = vst [vmem:[%s1482_s27 + $0xb0] sm:$0xff] %v1259_v42  }
 0x107   : > { %1335 = vst [vmem:[%s1482_s27 + $0xf0] sm:$0xff] %v1299_v43   ;;  %v640_v46 = vpop.f32.mrf.mxu2  ;;  %v680_v47 = vpop.f32.mrf.mxu3 }
 0x108   : > { %v562_v48 = vpop.f32.mrf.mxu0  ;;  %v602_v49 = vpop.f32.mrf.mxu1  ;;  %v641_v58 = vadd.f32 %v1471_v36, %v640_v46  ;;  %v681_v59 = vadd.f32 %v1471_v36, %v680_v47 }
 0x109   : > { %v563_v50 = vadd.f32 %v1471_v36, %v562_v48  ;;  %v603_v51 = vadd.f32 %v1471_v36, %v602_v49 }
 0x10a   : > { %v731_v0 = vmax.f32 %v641_v58, 0.0  ;;  %v747_v1 = vmax.f32 %v681_v59, 0.0 }
 0x10b   : > { %v700_v54 = vmax.f32 %v563_v50, 0.0  ;;  %v716_v55 = vmax.f32 %v603_v51, 0.0 }
 0x10d   : > { %v1184_v56 = vpack.c.bf16 %v700_v54, %v699_v52  ;;  %v1224_v57 = vpack.c.bf16 %v716_v55, %v715_v53 }
 0x10f   : > { %1312 = vst [vmem:[%s1482_s27 + $0x38] sm:$0xff] %v1184_v56   ;;  %v642_v60 = vpop.f32.mrf.mxu2  ;;  %v682_v61 = vpop.f32.mrf.mxu3 }
 0x110   : > { %1320 = vst [vmem:[%s1482_s27 + $0x78] sm:$0xff] %v1224_v57   ;;  %v643_v62 = vadd.f32 %v1471_v36, %v642_v60  ;;  %v683_v63 = vadd.f32 %v1471_v36, %v682_v61 }
 0x112   : > { %v732_v2 = vmax.f32 %v643_v62, 0.0  ;;  %v748_v3 = vmax.f32 %v683_v63, 0.0 }
 0x114   : > { %v1264_v4 = vpack.c.bf16 %v732_v2, %v731_v0  ;;  %v1304_v5 = vpack.c.bf16 %v748_v3, %v747_v1 }
 0x116   : > { %1328 = vst [vmem:[%s1482_s27 + $0xb8] sm:$0xff] %v1264_v4  }
 0x117   : > { %1336 = vst [vmem:[%s1482_s27 + $0xf8] sm:$0xff] %v1304_v5  }
 0x118 PF: > { %s13_s12 = sadd.s32 1, %s1358_s12  }
 0x119   : > { %p10_p4 = scmp.ge.s32.totalorder %s13_s12, 4  }
 0x11b   :  { %12 = sbr.rel (!%p10_p4) target bundleno = 1 (0x1), region = 62 }

// kernel: multi_teacher_distill_forward.3
= control target key start
LH: loop header
LB: loop body
LE: loop exit
PB: predicated region body
PF: predicated region fallthrough
CT: control target
= control target key end

     0   :  { %s1928_s27 = smov 0   ;;  %s1930_s28 = smov 0   ;;  %s2525_s0 = inlined_call_operand.vmem [shape: bf16[4,64,432], index: 0, kind: input, shape index: {}]   ;;  %s2526_s1 = inlined_call_operand.vmem [shape: bf16[432,256], index: 1, kind: input, shape index: {}]   ;;  %s2527_s2 = inlined_call_operand.vmem [shape: f32[1,256], index: 2, kind: input, shape index: {}]   ;;  %s2528_s3 = inlined_call_operand.vmem [shape: f32[64,32], index: 3, kind: input, shape index: {}]   ;;  %s2529_s4 = inlined_call_operand.vmem [shape: f32[1,32], index: 4, kind: input, shape index: {}]   ;;  %s2530_s5 = inlined_call_operand.vmem [shape: f32[2,1,64], index: 5, kind: input, shape index: {}]   ;;  %s2531_s6 = inlined_call_operand.vmem [shape: f32[2,64,32], index: 6, kind: input, shape index: {}]   ;;  %s2532_s7 = inlined_call_operand.vmem [shape: f32[4,1,32], index: 7, kind: output, shape index: {0}]   ;;  %s2533_s8 = inlined_call_operand.vmem [shape: f32[4,2,32], index: 8, kind: output, shape index: {1}]  }
   0x1   :  { %s1932_s29 = smov 0  }
   0x2 LB: > { %s31_s30 = sadd.s32 1, %s1874_s28  ;;  %p1414_p0 = scmp.ge.s32.totalorder %s1878_s29, 1  ;;  %s1878_s29 = sphi %s1932_s29, %s19_s29   ;;  %s1874_s28 = sphi %s1930_s28, %s2537_s28   ;;  %s1870_s27 = sphi %s1928_s27, %s2536_s27  }
   0x3   : > { %p33_p1 = scmp.ge.s32.totalorder %s31_s30, 4  ;;  %p285_p2 = scmp.lt.s32.totalorder %s1878_s29, 5 }
   0x5   : > { %s2539_s30 = smov (%p33_p1, %s31_s30), 0  ;;  %p286_p3 = pnand %p1414_p0, %p285_p2 }
   0x6   : > { %p327_p4 = scmp.lt.s32.totalorder (!%p286_p3), %s1870_s27, 3  ;;  %s1882_s10 = smov (!%p286_p3), 64  }
   0x7   : > { %289 = sbr.rel (%p286_p3) target bundleno = 1138 (0x472), region = 48 }
   0xc   : > { %v1540_v0 = vld [vmem:[%s2526_s1 + $0x70] sm:$0xf]  ;;  %v1754_v1 = vld [vmem:[%s2526_s1 + $0x74] sm:$0xf0]  ;;  %v1532_v9 = vld [vmem:[%s2526_s1 + $0x60] sm:$0xf] }
   0xd   : > { %v1604_v2 = vld [vmem:[%s2526_s1 + $0xf0] sm:$0xf]  ;;  %v1541_v3 = vor.u32 %v1754_v1, %v1540_v0  ;;  %v1770_v4 = vld [vmem:[%s2526_s1 + $0xf4] sm:$0xf0]  ;;  %v1752_v10 = vld [vmem:[%s2526_s1 + $0x64] sm:$0xf0] }
   0xe   : > { %v1668_v5 = vld [vmem:[%s2526_s1 + $0x170] sm:$0xf]  ;;  %v1786_v6 = vld [vmem:[%s2526_s1 + $0x174] sm:$0xf0]  ;;  %v1605_v7 = vor.u32 %v1770_v4, %v1604_v2  ;;  %v1596_v11 = vld [vmem:[%s2526_s1 + $0xe0] sm:$0xf]  ;;  %v1533_v12 = vor.u32 %v1752_v10, %v1532_v9 }
   0xf   : > { %v1669_v8 = vor.u32 %v1786_v6, %v1668_v5  ;;  %789 = vmatpush.bf16.msra.mxu0 %v1541_v3  ;;  %v1768_v13 = vld [vmem:[%s2526_s1 + $0xe4] sm:$0xf0]  ;;  %v1660_v14 = vld [vmem:[%s2526_s1 + $0x160] sm:$0xf]  ;;  %v1524_v20 = vld [vmem:[%s2526_s1 + $0x50] sm:$0xf] }
  0x10   : > { %v1784_v15 = vld [vmem:[%s2526_s1 + $0x164] sm:$0xf0]  ;;  %818 = vmatpush.bf16.msra.mxu1 %v1605_v7  ;;  %v1597_v16 = vor.u32 %v1768_v13, %v1596_v11  ;;  %v1692_v18 = vld [vmem:[%s2526_s1 + $0x1a0] sm:$0xf]  ;;  %v1750_v22 = vld [vmem:[%s2526_s1 + $0x54] sm:$0xf0] }
  0x11   : > { %847 = vmatpush.bf16.msra.mxu2 %v1669_v8  ;;  %v1661_v17 = vor.u32 %v1784_v15, %v1660_v14  ;;  %v1792_v19 = vld [vmem:[%s2526_s1 + $0x1a4] sm:$0xf0]  ;;  %v1588_v23 = vld [vmem:[%s2526_s1 + $0xd0] sm:$0xf]  ;;  %v1766_v24 = vld [vmem:[%s2526_s1 + $0xd4] sm:$0xf0]  ;;  %v1525_v28 = vor.u32 %v1750_v22, %v1524_v20 }
  0x12   : > { %v1693_v21 = vor.u32 %v1792_v19, %v1692_v18  ;;  %v1652_v25 = vld [vmem:[%s2526_s1 + $0x150] sm:$0xf]  ;;  %v1782_v26 = vld [vmem:[%s2526_s1 + $0x154] sm:$0xf0]  ;;  %v1516_v30 = vld [vmem:[%s2526_s1 + $0x40] sm:$0xf]  ;;  %v1589_v32 = vor.u32 %v1766_v24, %v1588_v23 }
  0x13   : > { %v1684_v27 = vld [vmem:[%s2526_s1 + $0x190] sm:$0xf]  ;;  %790 = vmatpush.bf16.msra.mxu0 %v1533_v12  ;;  %v1790_v29 = vld [vmem:[%s2526_s1 + $0x194] sm:$0xf0]  ;;  %v1748_v31 = vld [vmem:[%s2526_s1 + $0x44] sm:$0xf0]  ;;  %v1653_v33 = vor.u32 %v1782_v26, %v1652_v25 }
  0x14   : > { %881 = vmatpush.bf16.msra.mxu3 %v1693_v21  ;;  %819 = vmatpush.bf16.msra.mxu1 %v1597_v16  ;;  %v1685_v34 = vor.u32 %v1790_v29, %v1684_v27  ;;  %v1580_v35 = vld [vmem:[%s2526_s1 + $0xc0] sm:$0xf]  ;;  %v1764_v36 = vld [vmem:[%s2526_s1 + $0xc4] sm:$0xf0]  ;;  %v1517_v41 = vor.u32 %v1748_v31, %v1516_v30  ;;  %v1508_v43 = vld [vmem:[%s2526_s1 + $0x30] sm:$0xf] }
  0x15   : > { %848 = vmatpush.bf16.msra.mxu2 %v1661_v17  ;;  %v1644_v37 = vld [vmem:[%s2526_s1 + $0x140] sm:$0xf]  ;;  %v1780_v38 = vld [vmem:[%s2526_s1 + $0x144] sm:$0xf0]  ;;  %v1581_v44 = vor.u32 %v1764_v36, %v1580_v35  ;;  %v1746_v46 = vld [vmem:[%s2526_s1 + $0x34] sm:$0xf0] }
  0x16   : > { %v1676_v39 = vld [vmem:[%s2526_s1 + $0x180] sm:$0xf]  ;;  %v1788_v40 = vld [vmem:[%s2526_s1 + $0x184] sm:$0xf0]  ;;  %v1645_v45 = vor.u32 %v1780_v38, %v1644_v37  ;;  %v1572_v47 = vld [vmem:[%s2526_s1 + $0xb0] sm:$0xf]  ;;  %v1509_v51 = vor.u32 %v1746_v46, %v1508_v43 }
  0x17   : > { %791 = vmatpush.bf16.msra.mxu0 %v1525_v28  ;;  %v1677_v42 = vor.u32 %v1788_v40, %v1676_v39  ;;  %v1762_v48 = vld [vmem:[%s2526_s1 + $0xb4] sm:$0xf0]  ;;  %v1636_v49 = vld [vmem:[%s2526_s1 + $0x130] sm:$0xf]  ;;  %s2541_s27 = smov (!%p327_p4, %s1870_s27), 3  ;;  %vm776_vm0 = vcmask 392192  }
  0x18   : > { %882 = vmatpush.bf16.msra.mxu3 %v1685_v34  ;;  %820 = vmatpush.bf16.msra.mxu1 %v1589_v32  ;;  %v1778_v50 = vld [vmem:[%s2526_s1 + $0x134] sm:$0xf0]  ;;  %v1500_v52 = vld [vmem:[%s2526_s1 + $0x20] sm:$0xf]  ;;  %v1744_v53 = vld [vmem:[%s2526_s1 + $0x24] sm:$0xf0]  ;;  %v1573_v55 = vor.u32 %v1762_v48, %v1572_v47  ;;  %s339_s26 = scalar_lea.vmem %s2532_s7, %s2541_s27 }
  0x19   : > { %849 = vmatpush.bf16.msra.mxu2 %v1653_v33  ;;  %v1564_v54 = vld [vmem:[%s2526_s1 + $0xa0] sm:$0xf]  ;;  %v1637_v56 = vor.u32 %v1778_v50, %v1636_v49  ;;  %s1722_s15 = sshll.u32 %s2541_s27, 7  ;;  %v1760_v57 = vld [vmem:[%s2526_s1 + $0xa4] sm:$0xf0]  ;;  %v1501_v2 = vor.u32 %v1744_v53, %v1500_v52  ;;  %vm1070_vm1 = vcmask 523264  }
  0x1a   : > { %v1628_v58 = vld [vmem:[%s2526_s1 + $0x120] sm:$0xf]  ;;  %s2079_s22 = scalar_lea.vmem %s2525_s0, %s1722_s15  ;;  %v1776_v59 = vld [vmem:[%s2526_s1 + $0x124] sm:$0xf0]  ;;  %v1753_v60 = vld [vmem:[%s2526_s1 + $0x74] sm:$0xf]  ;;  %v1565_v3 = vor.u32 %v1760_v57, %v1564_v54 }
  0x1b   : > { %792 = vmatpush.bf16.msra.mxu0 %v1517_v41  ;;  %v1542_v61 = vld [vmem:[%s2526_s1 + $0x78] sm:$0xf0]  ;;  %v1724_v62 = vld [vmem:[%s2079_s22 + $0xc] sm:$0xf]  ;;  %v1629_v4 = vor.u32 %v1776_v59, %v1628_v58  ;;  %v1492_v5 = vld [vmem:[%s2526_s1 + $0x10] sm:$0xf] }
  0x1c   : > { %883 = vmatpush.bf16.msra.mxu3 %v1677_v42  ;;  %821 = vmatpush.bf16.msra.mxu1 %v1581_v44  ;;  %v1430_v63 = vld [vmem:[%s2079_s22 + $0x18] sm:$0xf0]  ;;  %v1545_v0 = vor.u32 %v1753_v60, %v1542_v61  ;;  %v1742_v6 = vld [vmem:[%s2526_s1 + $0x14] sm:$0xf0]  ;;  %v1556_v7 = vld [vmem:[%s2526_s1 + $0x90] sm:$0xf] }
  0x1d   : > { %850 = vmatpush.bf16.msra.mxu2 %v1645_v45  ;;  %v2092_v1 = vor.u32 %v1724_v62, %v1430_v63  ;;  %v1758_v8 = vld [vmem:[%s2526_s1 + $0x94] sm:$0xf0]  ;;  %v1620_v9 = vld [vmem:[%s2526_s1 + $0x110] sm:$0xf]  ;;  %v1484_v11 = vld [vmem:[%s2526_s1] sm:$0xf]  ;;  %v1493_v13 = vor.u32 %v1742_v6, %v1492_v5 }
  0x1e   : > { %v1774_v10 = vld [vmem:[%s2526_s1 + $0x114] sm:$0xf0]  ;;  %v1740_v12 = vld [vmem:[%s2526_s1 + $0x4] sm:$0xf0]  ;;  %v1548_v14 = vld [vmem:[%s2526_s1 + $0x80] sm:$0xf]  ;;  %v1557_v17 = vor.u32 %v1758_v8, %v1556_v7 }
  0x1f   : > { %793 = vmatpush.bf16.msra.mxu0 %v1509_v51  ;;  %1698 = vmatmul.msk.bf16.vlgmr.msra.gmra.mxu3 %vm776_vm0, %v2092_v1  ;;  %v1756_v15 = vld [vmem:[%s2526_s1 + $0x84] sm:$0xf0]  ;;  %v1751_v16 = vld [vmem:[%s2526_s1 + $0x64] sm:$0xf]  ;;  %v1621_v18 = vor.u32 %v1774_v10, %v1620_v9  ;;  %v1612_v19 = vld [vmem:[%s2526_s1 + $0x100] sm:$0xf]  ;;  %v1485_v31 = vor.u32 %v1740_v12, %v1484_v11 }
  0x20   : > { %822 = vmatpush.bf16.msra.mxu1 %v1573_v55  ;;  %905 = vmatpush.bf16.msrb.mxu3 %v1545_v0  ;;  %v1772_v20 = vld [vmem:[%s2526_s1 + $0x104] sm:$0xf0]  ;;  %v1534_v21 = vld [vmem:[%s2526_s1 + $0x68] sm:$0xf0]  ;;  %v1420_v22 = vld [vmem:[%s2079_s22] sm:$0xf]  ;;  %v1549_v36 = vor.u32 %v1756_v15, %v1548_v14 }
  0x21   : > { %851 = vmatpush.bf16.msra.mxu2 %v1637_v56  ;;  %v1725_v23 = vld [vmem:[%s2079_s22 + $0xc] sm:$0xf0]  ;;  %v1791_v24 = vld [vmem:[%s2526_s1 + $0x1a4] sm:$0xf]  ;;  %v1694_v25 = vld [vmem:[%s2526_s1 + $0x1a8] sm:$0xf0]  ;;  %v1537_v26 = vor.u32 %v1751_v16, %v1534_v21  ;;  %v1613_v37 = vor.u32 %v1772_v20, %v1612_v19 }
  0x22   : > { %v1749_v27 = vld [vmem:[%s2526_s1 + $0x54] sm:$0xf]  ;;  %v1606_v29 = vld [vmem:[%s2526_s1 + $0xf8] sm:$0xf0]  ;;  %v1723_v32 = vld [vmem:[%s2079_s22 + $0x4] sm:$0xf]  ;;  %v1697_v41 = vor.u32 %v1791_v24, %v1694_v25  ;;  %v2173_v46 = vor.u32 %v1725_v23, %v1420_v22 }
  0x23   : > { %794 = vmatpush.bf16.msra.mxu0 %v1501_v2  ;;  %v1769_v28 = vld [vmem:[%s2526_s1 + $0xf4] sm:$0xf]  ;;  %v1526_v30 = vld [vmem:[%s2526_s1 + $0x58] sm:$0xf0]  ;;  %v1428_v39 = vld [vmem:[%s2079_s22 + $0x8] sm:$0xf] }
  0x24   : > { %823 = vmatpush.bf16.msra.mxu1 %v1565_v3  ;;  %906 = vmatpush.bf16.msrb.mxu3 %v1537_v26  ;;  %v1785_v33 = vld [vmem:[%s2526_s1 + $0x174] sm:$0xf]  ;;  %v1670_v34 = vld [vmem:[%s2526_s1 + $0x178] sm:$0xf0]  ;;  %v1529_v35 = vor.u32 %v1749_v27, %v1526_v30  ;;  %v1726_v40 = vld [vmem:[%s2079_s22 + $0x14] sm:$0xf0]  ;;  %v1609_v44 = vor.u32 %v1769_v28, %v1606_v29 }
  0x25   : > { %852 = vmatpush.bf16.msra.mxu2 %v1629_v4  ;;  %v1422_v38 = vld [vmem:[%s2079_s22 + $0x10] sm:$0xf0]  ;;  %v1728_v42 = vld [vmem:[%s2079_s22 + $0x2c] sm:$0xf]  ;;  %v1446_v43 = vld [vmem:[%s2079_s22 + $0x38] sm:$0xf0]  ;;  %v1673_v47 = vor.u32 %v1785_v33, %v1670_v34  ;;  %v2186_v52 = vor.u32 %v1726_v40, %v1428_v39 }
  0x26   : > { %v1767_v45 = vld [vmem:[%s2526_s1 + $0xe4] sm:$0xf]  ;;  %v1598_v48 = vld [vmem:[%s2526_s1 + $0xe8] sm:$0xf0]  ;;  %v2184_v51 = vor.u32 %v1723_v32, %v1422_v38  ;;  %v1789_v56 = vld [vmem:[%s2526_s1 + $0x194] sm:$0xf]  ;;  %v2200_v58 = vor.u32 %v1728_v42, %v1446_v43 }
  0x27   : > { %795 = vmatpush.bf16.msra.mxu0 %v1493_v13  ;;  %v1747_v49 = vld [vmem:[%s2526_s1 + $0x44] sm:$0xf]  ;;  %v1518_v50 = vld [vmem:[%s2526_s1 + $0x48] sm:$0xf0]  ;;  %v1686_v57 = vld [vmem:[%s2526_s1 + $0x198] sm:$0xf0]  ;;  %v1601_v59 = vor.u32 %v1767_v45, %v1598_v48 }
  0x28   : > { %824 = vmatpush.bf16.msra.mxu1 %v1557_v17  ;;  %907 = vmatpush.bf16.msrb.mxu3 %v1529_v35  ;;  %v1783_v53 = vld [vmem:[%s2526_s1 + $0x164] sm:$0xf]  ;;  %v1662_v54 = vld [vmem:[%s2526_s1 + $0x168] sm:$0xf0]  ;;  %v1521_v55 = vor.u32 %v1747_v49, %v1518_v50  ;;  %v1745_v60 = vld [vmem:[%s2526_s1 + $0x34] sm:$0xf]  ;;  %v1689_v2 = vor.u32 %v1789_v56, %v1686_v57 }
  0x29   : > { %853 = vmatpush.bf16.msra.mxu2 %v1621_v18  ;;  %v1510_v61 = vld [vmem:[%s2526_s1 + $0x38] sm:$0xf0]  ;;  %v1665_v62 = vor.u32 %v1783_v53, %v1662_v54  ;;  %v1765_v63 = vld [vmem:[%s2526_s1 + $0xd4] sm:$0xf]  ;;  %v1743_v7 = vld [vmem:[%s2526_s1 + $0x24] sm:$0xf] }
  0x2a   : > { %v1590_v0 = vld [vmem:[%s2526_s1 + $0xd8] sm:$0xf0]  ;;  %v1781_v3 = vld [vmem:[%s2526_s1 + $0x154] sm:$0xf]  ;;  %v1513_v5 = vor.u32 %v1745_v60, %v1510_v61  ;;  %v1763_v9 = vld [vmem:[%s2526_s1 + $0xc4] sm:$0xf] }
  0x2b   : > { %796 = vmatpush.bf16.msra.mxu0 %v1485_v31  ;;  %v1654_v4 = vld [vmem:[%s2526_s1 + $0x158] sm:$0xf0]  ;;  %v1593_v6 = vor.u32 %v1765_v63, %v1590_v0  ;;  %v1582_v10 = vld [vmem:[%s2526_s1 + $0xc8] sm:$0xf0]  ;;  %v1779_v12 = vld [vmem:[%s2526_s1 + $0x144] sm:$0xf] }
  0x2c   : > { %825 = vmatpush.bf16.msra.mxu1 %v1549_v36  ;;  %908 = vmatpush.bf16.msrb.mxu3 %v1521_v55  ;;  %v1657_v8 = vor.u32 %v1781_v3, %v1654_v4  ;;  %v1502_v11 = vld [vmem:[%s2526_s1 + $0x28] sm:$0xf0]  ;;  %v1741_v15 = vld [vmem:[%s2526_s1 + $0x14] sm:$0xf]  ;;  %v1436_v16 = vld [vmem:[%s2079_s22 + $0x20] sm:$0xf]  ;;  %v1585_v17 = vor.u32 %v1763_v9, %v1582_v10 }
  0x2d   : > { %854 = vmatpush.bf16.msra.mxu2 %v1613_v37  ;;  %v1646_v13 = vld [vmem:[%s2526_s1 + $0x148] sm:$0xf0]  ;;  %v1505_v14 = vor.u32 %v1743_v7, %v1502_v11  ;;  %v1494_v18 = vld [vmem:[%s2526_s1 + $0x18] sm:$0xf0]  ;;  %v1787_v19 = vld [vmem:[%s2526_s1 + $0x184] sm:$0xf] }
  0x2e   : > { %797 = vmatmul.bf16.vlgmr.msra.gmra.mxu0 %v2173_v46  ;;  %v1678_v20 = vld [vmem:[%s2526_s1 + $0x188] sm:$0xf0]  ;;  %v1729_v21 = vld [vmem:[%s2079_s22 + $0x2c] sm:$0xf0]  ;;  %v1649_v22 = vor.u32 %v1779_v12, %v1646_v13  ;;  %v1761_v23 = vld [vmem:[%s2526_s1 + $0xb4] sm:$0xf]  ;;  %v1497_v32 = vor.u32 %v1741_v15, %v1494_v18 }
  0x2f   : > { %934 = vmatpush.bf16.msrb.mxu0 %v1609_v44  ;;  %826 = vmatmul.bf16.vlgmr.msra.gmra.mxu1 %v2184_v51  ;;  %v1574_v24 = vld [vmem:[%s2526_s1 + $0xb8] sm:$0xf0]  ;;  %v1681_v25 = vor.u32 %v1787_v19, %v1678_v20  ;;  %v1727_v26 = vld [vmem:[%s2079_s22 + $0x24] sm:$0xf]  ;;  %v1777_v27 = vld [vmem:[%s2526_s1 + $0x134] sm:$0xf]  ;;  %v2280_v37 = vor.u32 %v1729_v21, %v1436_v16 }
  0x30   : > { %963 = vmatpush.bf16.msrb.mxu1 %v1673_v47  ;;  %855 = vmatmul.bf16.vlgmr.msra.gmra.mxu2 %v2186_v52  ;;  %v1638_v28 = vld [vmem:[%s2526_s1 + $0x138] sm:$0xf0]  ;;  %v1438_v29 = vld [vmem:[%s2079_s22 + $0x30] sm:$0xf0]  ;;  %v1444_v30 = vld [vmem:[%s2079_s22 + $0x28] sm:$0xf]  ;;  %v1577_v34 = vor.u32 %v1761_v23, %v1574_v24 }
  0x31   : > { %997 = vmatpush.bf16.msrb.mxu2 %v1697_v41  ;;  %1699 = vmatmul.msk.bf16.gmra.mxu3 %vm776_vm0, %v2200_v58  ;;  %v1730_v31 = vld [vmem:[%s2079_s22 + $0x34] sm:$0xf0]  ;;  %v1732_v33 = vld [vmem:[%s2079_s22 + $0x4c] sm:$0xf]  ;;  %v1739_v35 = vld [vmem:[%s2526_s1 + $0x4] sm:$0xf]  ;;  %v1641_v39 = vor.u32 %v1777_v27, %v1638_v28  ;;  %v2289_v42 = vor.u32 %v1727_v26, %v1438_v29 }
  0x32   : > { %909 = vmatpush.bf16.msrb.mxu3 %v1513_v5  ;;  %v1486_v36 = vld [vmem:[%s2526_s1 + $0x8] sm:$0xf0]  ;;  %v1462_v38 = vld [vmem:[%s2079_s22 + $0x58] sm:$0xf0]  ;;  %v1759_v40 = vld [vmem:[%s2526_s1 + $0xa4] sm:$0xf]  ;;  %v2291_v43 = vor.u32 %v1730_v31, %v1444_v30 }
  0x33   : > { %935 = vmatpush.bf16.msrb.mxu0 %v1601_v59  ;;  %v1566_v41 = vld [vmem:[%s2526_s1 + $0xa8] sm:$0xf0]  ;;  %v1775_v44 = vld [vmem:[%s2526_s1 + $0x124] sm:$0xf]  ;;  %v1489_v47 = vor.u32 %v1739_v35, %v1486_v36  ;;  %v2299_v48 = vor.u32 %v1732_v33, %v1462_v38  ;;  %v1757_v53 = vld [vmem:[%s2526_s1 + $0x94] sm:$0xf] }
  0x34   : > { %964 = vmatpush.bf16.msrb.mxu1 %v1665_v62  ;;  %v1630_v45 = vld [vmem:[%s2526_s1 + $0x128] sm:$0xf0]  ;;  %v1569_v49 = vor.u32 %v1759_v40, %v1566_v41  ;;  %v1558_v54 = vld [vmem:[%s2526_s1 + $0x98] sm:$0xf0]  ;;  %v1773_v55 = vld [vmem:[%s2526_s1 + $0x114] sm:$0xf] }
  0x35   : > { %998 = vmatpush.bf16.msrb.mxu2 %v1689_v2  ;;  %v1633_v50 = vor.u32 %v1775_v44, %v1630_v45  ;;  %v1561_v56 = vor.u32 %v1757_v53, %v1558_v54  ;;  %v1622_v57 = vld [vmem:[%s2526_s1 + $0x118] sm:$0xf0]  ;;  %v1755_v59 = vld [vmem:[%s2526_s1 + $0x84] sm:$0xf]  ;;  %v1550_v60 = vld [vmem:[%s2526_s1 + $0x88] sm:$0xf0] }
  0x36   : > { %910 = vmatpush.bf16.msrb.mxu3 %v1505_v14  ;;  %v1625_v61 = vor.u32 %v1773_v55, %v1622_v57  ;;  %v1771_v62 = vld [vmem:[%s2526_s1 + $0x104] sm:$0xf]  ;;  %v1614_v63 = vld [vmem:[%s2526_s1 + $0x108] sm:$0xf0]  ;;  %v1553_v0 = vor.u32 %v1755_v59, %v1550_v60  ;;  %v1452_v3 = vld [vmem:[%s2079_s22 + $0x40] sm:$0xf] }
  0x37   : > { %936 = vmatpush.bf16.msrb.mxu0 %v1593_v6  ;;  %v1617_v2 = vor.u32 %v1771_v62, %v1614_v63  ;;  %v1733_v4 = vld [vmem:[%s2079_s22 + $0x4c] sm:$0xf0]  ;;  %v1731_v5 = vld [vmem:[%s2079_s22 + $0x44] sm:$0xf]  ;;  %v1454_v6 = vld [vmem:[%s2079_s22 + $0x50] sm:$0xf0] }
  0x38   : > { %965 = vmatpush.bf16.msrb.mxu1 %v1657_v8  ;;  %v1460_v7 = vld [vmem:[%s2079_s22 + $0x48] sm:$0xf]  ;;  %v1734_v8 = vld [vmem:[%s2079_s22 + $0x54] sm:$0xf0]  ;;  %v1453_v9 = vor.u32 %v1733_v4, %v1452_v3  ;;  %v1736_v10 = vld [vmem:[%s2079_s22 + $0x6c] sm:$0xf]  ;;  %v1457_v12 = vor.u32 %v1731_v5, %v1454_v6 }
  0x39   : > { %999 = vmatpush.bf16.msrb.mxu2 %v1681_v25  ;;  %v1478_v11 = vld [vmem:[%s2079_s22 + $0x78] sm:$0xf0]  ;;  %v1461_v13 = vor.u32 %v1734_v8, %v1460_v7  ;;  %v1468_v15 = vld [vmem:[%s2079_s22 + $0x60] sm:$0xf]  ;;  %v1737_v16 = vld [vmem:[%s2079_s22 + $0x6c] sm:$0xf0] }
  0x3a   : > { %911 = vmatpush.bf16.msrb.mxu3 %v1497_v32  ;;  %v1481_v14 = vor.u32 %v1736_v10, %v1478_v11  ;;  %v1470_v18 = vld [vmem:[%s2079_s22 + $0x70] sm:$0xf0]  ;;  %v1476_v19 = vld [vmem:[%s2079_s22 + $0x68] sm:$0xf]  ;;  %v1738_v20 = vld [vmem:[%s2079_s22 + $0x74] sm:$0xf0]  ;;  %v1469_v21 = vor.u32 %v1737_v16, %v1468_v15 }
  0x3b   : > { %937 = vmatpush.bf16.msrb.mxu0 %v1585_v17  ;;  %v1735_v17 = vld [vmem:[%s2079_s22 + $0x64] sm:$0xf]  ;;  %v1477_v23 = vor.u32 %v1738_v20, %v1476_v19  ;;  %vm1117_vm3 = vcmask 1040384   ;;  %vm1172_vm9 = vcmask 516096   ;;  %vm1164_vm10 = vcmask 253952  }
  0x3c   : > { %966 = vmatpush.bf16.msrb.mxu1 %v1649_v22  ;;  %v1473_v22 = vor.u32 %v1735_v17, %v1470_v18 }
  0x3e   : > { %802 = vmatmul.bf16.gmra.mxu0 %v2280_v37  ;;  %912 = vmatpush.bf16.msrb.mxu3 %v1489_v47 }
  0x3f   : > { %938 = vmatpush.bf16.msrb.mxu0 %v1577_v34  ;;  %831 = vmatmul.bf16.gmra.mxu1 %v2289_v42 }
  0x40   : > { %967 = vmatpush.bf16.msrb.mxu1 %v1641_v39  ;;  %860 = vmatmul.bf16.gmra.mxu2 %v2291_v43 }
  0x41   : > { %1700 = vmatmul.msk.bf16.gmra.mxu3 %vm776_vm0, %v2299_v48 }
  0x43   : > { %939 = vmatpush.bf16.msrb.mxu0 %v1569_v49 }
  0x44   : > { %968 = vmatpush.bf16.msrb.mxu1 %v1633_v50 }
  0x47   : > { %940 = vmatpush.bf16.msrb.mxu0 %v1561_v56 }
  0x48   : > { %969 = vmatpush.bf16.msrb.mxu1 %v1625_v61 }
  0x4b   : > { %941 = vmatpush.bf16.msrb.mxu0 %v1553_v0 }
  0x4c   : > { %970 = vmatpush.bf16.msrb.mxu1 %v1617_v2 }
  0x4e   : > { %807 = vmatmul.bf16.gmra.mxu0 %v1453_v9 }
  0x4f   : > { %836 = vmatmul.bf16.gmra.mxu1 %v1457_v12 }
  0x50   : > { %865 = vmatmul.bf16.gmra.mxu2 %v1461_v13 }
  0x51   : > { %1701 = vmatmul.msk.bf16.gmra.mxu3 %vm776_vm0, %v1481_v14 }
  0x5e   : > { %812 = vmatmul.bf16.gmra.mxu0 %v1469_v21 }
  0x5f   : > { %841 = vmatmul.bf16.gmra.mxu1 %v1473_v22 }
  0x60   : > { %870 = vmatmul.bf16.gmra.mxu2 %v1477_v23 }
  0x61   : > { %913 = vmatmul.bf16.vlgmr.msrb.gmra.mxu3 %v2173_v46  ;;  %v424_v46 = vld [vmem:[%s2527_s2] sm:$0x3] }
  0x62   : > { %v2367_v3 = vperm.slane %v424_v46, 1 }
  0x6e   : > { %942 = vmatmul.bf16.vlgmr.msrb.gmra.mxu0 %v2184_v51  ;;  %v426_v51 = vperm.slane %v424_v46, 0 }
  0x6f   : > { %971 = vmatmul.bf16.vlgmr.msrb.gmra.mxu1 %v2186_v52 }
  0x70   : > { %1702 = vmatmul.msk.bf16.vlgmr.msrb.gmra.mxu2 %vm776_vm0, %v2092_v1 }
  0x71   : > { %918 = vmatmul.bf16.gmra.mxu3 %v2280_v37 }
  0x7e   : > { %947 = vmatmul.bf16.gmra.mxu0 %v2289_v42 }
  0x7f   : > { %976 = vmatmul.bf16.gmra.mxu1 %v2291_v43 }
  0x80   : > { %1703 = vmatmul.msk.bf16.gmra.mxu2 %vm776_vm0, %v2200_v58 }
  0x81   : > { %923 = vmatmul.bf16.gmra.mxu3 %v1453_v9 }
  0x8e   : > { %952 = vmatmul.bf16.gmra.mxu0 %v1457_v12 }
  0x8f   : > { %981 = vmatmul.bf16.gmra.mxu1 %v1461_v13 }
  0x90   : > { %1704 = vmatmul.msk.bf16.gmra.mxu2 %vm776_vm0, %v2299_v48 }
  0x91   : > { %928 = vmatmul.bf16.gmra.mxu3 %v1469_v21 }
  0x9e   : > { %957 = vmatmul.bf16.gmra.mxu0 %v1473_v22 }
  0x9f   : > { %986 = vmatmul.bf16.gmra.mxu1 %v1477_v23 }
  0xa0   : > { %1705 = vmatmul.msk.bf16.gmra.mxu2 %vm776_vm0, %v1481_v14 }
  0xa2   : > { %v885_v1 = vpop.f32.mrf.mxu3 }
  0xaa   : > { %v2361_v25 = vpop.f32.mrf.mxu3 }
  0xab   : > { %v798_v52 = vpop.f32.mrf.mxu0 }
  0xac   : > { %v799_v24 = vadd.f32 %v798_v52, %v426_v51  ;;  %v827_v58 = vpop.f32.mrf.mxu1 }
  0xae   : > { %v828_v26 = vadd.f32 %v827_v58, %v799_v24 }
  0xb3   : > { %v856_v27 = vpop.f32.mrf.mxu2  ;;  %v800_v29 = vpop.f32.mrf.mxu0 }
  0xb4   : > { %v857_v28 = vadd.f32 %v856_v27, %v828_v26  ;;  %v829_v30 = vpop.f32.mrf.mxu1  ;;  %v2363_v31 = vpop.f32.mrf.mxu3  ;;  %v801_v10 = vadd.f32 %v800_v29, %v426_v51 }
  0xb6   : > { %v2365_v32 = vadd.f32 %v885_v1, %v857_v28  ;;  %v830_v22 = vadd.f32 %v829_v30, %v801_v10 }
  0xbb   : > { %v858_v33 = vpop.f32.mrf.mxu2  ;;  %v803_v34 = vpop.f32.mrf.mxu0 }
  0xbc   : > { %v832_v35 = vpop.f32.mrf.mxu1  ;;  %v892_v36 = vpop.f32.mrf.mxu3  ;;  %v804_v63 = vadd.f32 %v803_v34, %v426_v51  ;;  %v859_v26 = vadd.f32 %v858_v33, %v830_v22 }
  0xbe   : > { %v833_v11 = vadd.f32 %v832_v35, %v804_v63  ;;  %v888_v30 = vadd.f32 %v2361_v25, %v859_v26  ;;  %v1021_v25 = vmax.f32 %v2365_v32, 1e-06 }
  0xc0   : > { %v1037_v63 = vmul.f32 %v1021_v25, %v1021_v25 }
  0xc3   : > { %v861_v37 = vpop.f32.mrf.mxu2  ;;  %v805_v38 = vpop.f32.mrf.mxu0 }
  0xc4   : > { %v834_v39 = vpop.f32.mrf.mxu1  ;;  %v895_v40 = vpop.f32.mrf.mxu3  ;;  %v806_v0 = vadd.f32 %v805_v38, %v426_v51  ;;  %v862_v52 = vadd.f32 %v861_v37, %v833_v11 }
  0xc6   : > { %v835_v13 = vadd.f32 %v834_v39, %v806_v0  ;;  %v891_v35 = vadd.f32 %v2363_v31, %v862_v52 }
  0xcb   : > { %v863_v41 = vpop.f32.mrf.mxu2  ;;  %v808_v42 = vpop.f32.mrf.mxu0 }
  0xcc   : > { %v837_v43 = vpop.f32.mrf.mxu1  ;;  %v897_v44 = vpop.f32.mrf.mxu3  ;;  %v809_v57 = vadd.f32 %v808_v42, %v426_v51  ;;  %v864_v18 = vadd.f32 %v863_v41, %v835_v13 }
  0xce   : > { %v838_v5 = vadd.f32 %v837_v43, %v809_v57  ;;  %v893_v28 = vadd.f32 %v892_v36, %v864_v18  ;;  %v1025_v36 = vmax.f32 %v891_v35, 1e-06 }
  0xd0   : > { %v1027_v43 = vmax.f32 %v893_v28, 1e-06 }
  0xd3   : > { %v866_v45 = vpop.f32.mrf.mxu2  ;;  %v810_v47 = vpop.f32.mrf.mxu0 }
  0xd4   : > { %v839_v48 = vpop.f32.mrf.mxu1  ;;  %v900_v49 = vpop.f32.mrf.mxu3  ;;  %v811_v59 = vadd.f32 %v810_v47, %v426_v51  ;;  %v867_v14 = vadd.f32 %v866_v45, %v838_v5 }
  0xd6   : > { %v840_v6 = vadd.f32 %v839_v48, %v811_v59  ;;  %v896_v24 = vadd.f32 %v895_v40, %v867_v14 }
  0xd8   : > { %v1029_v38 = vmax.f32 %v896_v24, 1e-06 }
  0xda   : > { %v1045_v48 = vmul.f32 %v1029_v38, %v1029_v38 }
  0xdb   : > { %v868_v50 = vpop.f32.mrf.mxu2  ;;  %v813_v53 = vpop.f32.mrf.mxu0 }
  0xdc   : > { %v842_v54 = vpop.f32.mrf.mxu1  ;;  %v902_v55 = vpop.f32.mrf.mxu3  ;;  %v814_v56 = vadd.f32 %v813_v53, %v426_v51  ;;  %v869_v9 = vadd.f32 %v868_v50, %v840_v6  ;;  %v1043_v50 = vmul.f32 %v1027_v43, %v1027_v43 }
  0xde   : > { %v843_v60 = vadd.f32 %v842_v54, %v814_v56  ;;  %v898_v19 = vadd.f32 %v897_v44, %v869_v9  ;;  %v1041_v54 = vmul.f32 %v1025_v36, %v1025_v36 }
  0xe0   : > { %v1031_v29 = vmax.f32 %v898_v19, 1e-06  ;;  %v1057_v0 = vmul.f32 %v1041_v54, %v1025_v36 }
  0xe2   : > { %v1047_v44 = vmul.f32 %v1031_v29, %v1031_v29 }
  0xe3   : > { %v871_v61 = vpop.f32.mrf.mxu2  ;;  %v815_v62 = vpop.f32.mrf.mxu0 }
  0xe4   : > { %v844_v2 = vpop.f32.mrf.mxu1  ;;  %v914_v4 = vpop.f32.mrf.mxu3  ;;  %v872_v7 = vadd.f32 %v871_v61, %v843_v60  ;;  %v816_v8 = vadd.f32 %v815_v62, %v426_v51  ;;  %v1063_v53 = vmul.f32 %v1047_v44, %v1031_v29  ;;  %v1059_v60 = vmul.f32 %v1043_v50, %v1027_v43 }
  0xe5   : > { %v915_v12 = vadd.f32 %v914_v4, %v2367_v3  ;;  %v1053_v4 = vmul.f32 %v1037_v63, %v1021_v25 }
  0xe6   : > { %v901_v15 = vadd.f32 %v900_v49, %v872_v7  ;;  %v845_v16 = vadd.f32 %v844_v2, %v816_v8  ;;  %v1023_v49 = vmax.f32 %v888_v30, 1e-06 }
  0xe8   : > { %v1033_v51 = vmax.f32 %v901_v15, 1e-06  ;;  %v1039_v57 = vmul.f32 %v1023_v49, %v1023_v49 }
  0xea   : > { %v1049_v39 = vmul.f32 %v1033_v51, %v1033_v51  ;;  %v1055_v2 = vmul.f32 %v1039_v57, %v1023_v49 }
  0xeb   : > { %v873_v17 = vpop.f32.mrf.mxu2  ;;  %v943_v21 = vpop.f32.mrf.mxu0 }
  0xec   : > { %v874_v20 = vadd.f32 %v873_v17, %v845_v16  ;;  %v2370_v23 = vpop.f32.mrf.mxu3  ;;  %v944_v1 = vadd.f32 %v943_v21, %v915_v12  ;;  %v972_v46 = vpop.f32.mrf.mxu1  ;;  %v1065_v31 = vmul.f32 %v1049_v39, %v1033_v51  ;;  %v1880_v17 = vmov 1.0  }
  0xee   : > { %v903_v58 = vadd.f32 %v902_v55, %v874_v20  ;;  %v973_v27 = vadd.f32 %v972_v46, %v944_v1  ;;  %v1061_v55 = vmul.f32 %v1045_v48, %v1029_v38 }
  0xf0   : > { %v1035_v34 = vmax.f32 %v903_v58, 1e-06 }
  0xf2   : > { %v1051_v41 = vmul.f32 %v1035_v34, %v1035_v34 }
  0xf3   : > { %v1001_v42 = vpop.f32.mrf.mxu2  ;;  %v2376_v40 = vpop.f32.mrf.mxu0 }
  0xf4   : > { %v1067_v45 = vmul.f32 %v1051_v41, %v1035_v34  ;;  %v2374_v37 = vadd.f32 %v1001_v42, %v973_v27  ;;  %v919_v33 = vpop.f32.mrf.mxu3  ;;  %v2378_v47 = vpop.f32.mrf.mxu1  ;;  %v917_v42 = vadd.f32 %v2370_v23, %v2367_v3 }
  0xf5   : > { %v920_v52 = vadd.f32 %v919_v33, %v2367_v3 }
  0xf6   : > { %1082 = vmatpush.msra.mxu3 %v1067_v45  ;;  %v946_v33 = vadd.f32 %v2376_v40, %v917_v42 }
  0xf8   : > { %1083 = vmatpush.msra.mxu3 %v1065_v31  ;;  %v975_v57 = vadd.f32 %v2378_v47, %v946_v33 }
  0xfa   : > { %1084 = vmatpush.msra.mxu3 %v1063_v53 }
  0xfb   : > { %v2381_v56 = vpop.f32.mrf.mxu2  ;;  %v948_v59 = vpop.f32.mrf.mxu0 }
  0xfc   : > { %1085 = vmatpush.msra.mxu3 %v1061_v55  ;;  %v921_v61 = vpop.f32.mrf.mxu3  ;;  %v977_v62 = vpop.f32.mrf.mxu1  ;;  %v949_v35 = vadd.f32 %v948_v59, %v920_v52  ;;  %v1004_v23 = vadd.f32 %v2381_v56, %v975_v57 }
  0xfd   : > { %v922_v29 = vadd.f32 %v921_v61, %v2367_v3 }
  0xfe   : > { %1086 = vmatpush.msra.mxu3 %v1059_v60  ;;  %v978_v36 = vadd.f32 %v977_v62, %v949_v35 }
 0x100   : > { %1087 = vmatpush.msra.mxu3 %v1057_v0 }
 0x102   : > { %1088 = vmatpush.msra.mxu3 %v1055_v2 }
 0x103   : > { %v1006_v5 = vpop.f32.mrf.mxu2  ;;  %v950_v32 = vpop.f32.mrf.mxu0 }
 0x104   : > { %1089 = vmatpush.msra.mxu3 %v1053_v4  ;;  %v924_v6 = vpop.f32.mrf.mxu3  ;;  %v979_v7 = vpop.f32.mrf.mxu1  ;;  %v951_v38 = vadd.f32 %v950_v32, %v922_v29  ;;  %v1007_v59 = vadd.f32 %v1006_v5, %v978_v36  ;;  %v1024_v32 = vmax.f32 %v1004_v23, 1e-06  ;;  %v1716_v23 = vld [vmem:[%s2531_s6 + $0x68] sm:$0xff] }
 0x105   : > { %1706 = vmatmul.msk.f32.vlgmr.msra.gmra.mxu3 %vm1070_vm1, %v1880_v17  ;;  %v925_v21 = vadd.f32 %v924_v6, %v2367_v3 }
 0x106   : > { %v980_v31 = vadd.f32 %v979_v7, %v951_v38  ;;  %v1026_v62 = vmax.f32 %v1007_v59, 1e-06 }
 0x108   : > { %v1042_v47 = vmul.f32 %v1026_v62, %v1026_v62 }
 0x10b   : > { %v1008_v8 = vpop.f32.mrf.mxu2  ;;  %v953_v9 = vpop.f32.mrf.mxu0 }
 0x10c   : > { %v926_v10 = vpop.f32.mrf.mxu3  ;;  %v982_v11 = vpop.f32.mrf.mxu1  ;;  %v954_v51 = vadd.f32 %v953_v9, %v925_v21  ;;  %v1009_v25 = vadd.f32 %v1008_v8, %v980_v31  ;;  %v1022_v8 = vmax.f32 %v2374_v37, 1e-06  ;;  %v1040_v9 = vmul.f32 %v1024_v32, %v1024_v32  ;;  %v1135_v21 = vld [vmem:[%s2528_s3 + $0x18] sm:$0xff]  ;;  %v1710_v37 = vld [vmem:[%s2530_s5 + $0x1] sm:$0x1] }
 0x10d   : > { %v927_v46 = vadd.f32 %v926_v10, %v2367_v3 }
 0x10e   : > { %v983_v39 = vadd.f32 %v982_v11, %v954_v51  ;;  %v1028_v63 = vmax.f32 %v1009_v25, 1e-06  ;;  %v1038_v56 = vmul.f32 %v1022_v8, %v1022_v8  ;;  %v1058_v11 = vmul.f32 %v1042_v47, %v1026_v62  ;;  %v1712_v62 = vld [vmem:[%s2531_s6 + $0x48] sm:$0xff]  ;;  %v1140_v47 = vld [vmem:[%s2529_s4] sm:$0x1] }
 0x110   : > { %v1044_v6 = vmul.f32 %v1028_v63, %v1028_v63 }
 0x112   : > { %v1060_v10 = vmul.f32 %v1044_v6, %v1028_v63  ;;  %v1715_v63 = vld [vmem:[%s2531_s6 + $0x60] sm:$0xff] }
 0x113   : > { %v1011_v12 = vpop.f32.mrf.mxu2  ;;  %v955_v13 = vpop.f32.mrf.mxu0 }
 0x114   : > { %v984_v14 = vpop.f32.mrf.mxu1  ;;  %v929_v15 = vpop.f32.mrf.mxu3  ;;  %v956_v58 = vadd.f32 %v955_v13, %v927_v46  ;;  %v1012_v49 = vadd.f32 %v1011_v12, %v983_v39  ;;  %v1056_v12 = vmul.f32 %v1040_v9, %v1024_v32  ;;  %v1054_v13 = vmul.f32 %v1038_v56, %v1022_v8  ;;  %v1132_v46 = vld [vmem:[%s2528_s3] sm:$0xff] }
 0x115   : > { %v930_v18 = vadd.f32 %v929_v15, %v2367_v3  ;;  %v1881_v15 = vmov 0.0  }
 0x116   : > { %v985_v41 = vadd.f32 %v984_v14, %v956_v58  ;;  %v1030_v60 = vmax.f32 %v1012_v49, 1e-06  ;;  %v349_v14 = vlaneseq }
 0x118   : > { %v1046_v2 = vmul.f32 %v1030_v60, %v1030_v60  ;;  %vm2399_vm2 = vcmp.lt.s32.totalorder %v349_v14, 256 }
 0x119   : > { %353 = vst.msk [vmem:[#allocation2] sm:$0x3] %vm2399_vm2, %v1881_v15 }
 0x11a   : > { %v1062_v5 = vmul.f32 %v1046_v2, %v1030_v60 }
 0x11b   : > { %v1013_v16 = vpop.f32.mrf.mxu2  ;;  %v958_v19 = vpop.f32.mrf.mxu0 }
 0x11c   : > { %v987_v20 = vpop.f32.mrf.mxu1  ;;  %v959_v22 = vadd.f32 %v958_v19, %v930_v18  ;;  %v931_v1 = vpop.f32.mrf.mxu3  ;;  %v1014_v44 = vadd.f32 %v1013_v16, %v985_v41  ;;  %v1188_v16 = vld [vmem:[%s2530_s5] sm:$0x1]  ;;  %v1139_v18 = vld [vmem:[%s2528_s3 + $0x38] sm:$0xff]  ;;  %v1137_v19 = vld [vmem:[%s2528_s3 + $0x28] sm:$0xff] }
 0x11d   : > { %v932_v26 = vadd.f32 %v931_v1, %v2367_v3  ;;  %1190 = vrot.lane.b32.xlu1 %v1188_v16, %s1882_s10  ;;  %1152 = vmatpush.msra.mxu0 %v1139_v18  ;;  %v1133_v1 = vld [vmem:[%s2528_s3 + $0x8] sm:$0xff] }
 0x11e   : > { %v988_v27 = vadd.f32 %v987_v20, %v959_v22  ;;  %v1032_v54 = vmax.f32 %v1014_v44, 1e-06  ;;  %v1136_v20 = vld [vmem:[%s2528_s3 + $0x20] sm:$0xff]  ;;  %v1134_v22 = vld [vmem:[%s2528_s3 + $0x10] sm:$0xff] }
 0x120   : > { %v1048_v0 = vmul.f32 %v1032_v54, %v1032_v54  ;;  %v1069_v51 = vld [vmem:[#allocation2] sm:$0x3] }
 0x122   : > { %v1064_v7 = vmul.f32 %v1048_v0, %v1032_v54  ;;  %v1714_v0 = vld [vmem:[%s2531_s6 + $0x58] sm:$0xff] }
 0x123   : > { %v1016_v24 = vpop.f32.mrf.mxu2  ;;  %v960_v28 = vpop.f32.mrf.mxu0 }
 0x124   : > { %v961_v34 = vadd.f32 %v960_v28, %v932_v26  ;;  %v1017_v30 = vadd.f32 %v1016_v24, %v988_v27  ;;  %v989_v43 = vpop.f32.mrf.mxu1 }
 0x126   : > { %v990_v45 = vadd.f32 %v989_v43, %v961_v34  ;;  %v1034_v50 = vmax.f32 %v1017_v30, 1e-06 }
 0x128   : > { %v1050_v61 = vmul.f32 %v1034_v50, %v1034_v50 }
 0x12a   : > { %v1066_v4 = vmul.f32 %v1050_v61, %v1034_v50  ;;  %v1718_v61 = vld [vmem:[%s2531_s6 + $0x78] sm:$0xff] }
 0x12b   : > { %v1018_v48 = vpop.f32.mrf.mxu2  ;;  %1286 = vmatpush.msra.mxu2 %v1718_v61 }
 0x12c   : > { %v1019_v53 = vadd.f32 %v1018_v48, %v990_v45 }
 0x12e   : > { %v1036_v55 = vmax.f32 %v1019_v53, 1e-06 }
 0x130   : > { %v1052_v3 = vmul.f32 %v1036_v55, %v1036_v55 }
 0x132   : > { %v1068_v40 = vmul.f32 %v1052_v3, %v1036_v55  ;;  %v1717_v3 = vld [vmem:[%s2531_s6 + $0x70] sm:$0xff] }
 0x133   : > { %1287 = vmatpush.msra.mxu2 %v1717_v3 }
 0x134   : > { %1102 = vmatpush.msrb.mxu3 %v1068_v40  ;;  %v1713_v40 = vld [vmem:[%s2531_s6 + $0x50] sm:$0xff] }
 0x135   : > { %1288 = vmatpush.msra.mxu2 %v1716_v23 }
 0x136   : > { %1103 = vmatpush.msrb.mxu3 %v1066_v4  ;;  %v1711_v4 = vld [vmem:[%s2531_s6 + $0x40] sm:$0xff] }
 0x137   : > { %1289 = vmatpush.msra.mxu2 %v1715_v63 }
 0x138   : > { %1104 = vmatpush.msrb.mxu3 %v1064_v7 }
 0x139   : > { %1290 = vmatpush.msra.mxu2 %v1714_v0 }
 0x13a   : > { %1105 = vmatpush.msrb.mxu3 %v1062_v5 }
 0x13b   : > { %1291 = vmatpush.msra.mxu2 %v1713_v40 }
 0x13c   : > { %1106 = vmatpush.msrb.mxu3 %v1060_v10 }
 0x13d   : > { %1292 = vmatpush.msra.mxu2 %v1712_v62 }
 0x13e   : > { %1107 = vmatpush.msrb.mxu3 %v1058_v11 }
 0x13f   : > { %1293 = vmatpush.msra.mxu2 %v1711_v4 }
 0x140   : > { %1108 = vmatpush.msrb.mxu3 %v1056_v12 }
 0x142   : > { %1109 = vmatpush.msrb.mxu3 %v1054_v13 }
 0x143   : > { %1707 = vmatmul.msk.f32.vlgmr.msrb.gmra.mxu3 %vm1070_vm1, %v1880_v17  ;;  %v1138_v17 = vld [vmem:[%s2528_s3 + $0x30] sm:$0xff] }
 0x144   : > { %1153 = vmatpush.msra.mxu0 %v1138_v17 }
 0x146   : > { %1154 = vmatpush.msra.mxu0 %v1137_v19 }
 0x148   : > { %1155 = vmatpush.msra.mxu0 %v1136_v20 }
 0x14a   : > { %1156 = vmatpush.msra.mxu0 %v1135_v21 }
 0x14c   : > { %1157 = vmatpush.msra.mxu0 %v1134_v22  ;;  %v1201_v22 = vld [vmem:[%s2531_s6 + $0x38] sm:$0xff] }
 0x14d   : > { %1216 = vmatpush.msra.mxu1 %v1201_v22 }
 0x14e   : > { %1158 = vmatpush.msra.mxu0 %v1133_v1  ;;  %v1200_v1 = vld [vmem:[%s2531_s6 + $0x30] sm:$0xff] }
 0x14f   : > { %1217 = vmatpush.msra.mxu1 %v1200_v1 }
 0x150   : > { %1159 = vmatpush.msra.mxu0 %v1132_v46 }
 0x188   : > { %v1091_v52 = vpop.f32.mrf.mxu3 }
 0x18f   : > { %v1191_v2 = vpop.permute.xlu1 %1190 }
 0x1c6   : > { %v1111_v24 = vpop.f32.mrf.mxu3 }
 0x1c7   : > { %v1116_v58 = vrot.slane %v1111_v24, 7 }
 0x1c9   : > { %v1118_v26 = vsel %vm1117_vm3, %v1091_v52, %v1116_v58  ;;  %v1199_v52 = vld [vmem:[%s2531_s6 + $0x28] sm:$0xff] }
 0x1ca   : > { %v1120_v27 = vadd.f32 %v1118_v26, %v1069_v51  ;;  %v1198_v51 = vld [vmem:[%s2531_s6 + $0x20] sm:$0xff]  ;;  %1218 = vmatpush.msra.mxu1 %v1199_v52  ;;  %v1197_v26 = vld [vmem:[%s2531_s6 + $0x18] sm:$0xff] }
 0x1cc   : > { %1125 = vst.msk [vmem:[#allocation2] sm:$0x3] %vm2399_vm2, %v1120_v27  ;;  %1219 = vmatpush.msra.mxu1 %v1198_v51 }
 0x1ce   : > { %1220 = vmatpush.msra.mxu1 %v1197_v26 }
 0x1d3   : > { %v1129_v28 = vld [vmem:[#allocation2] sm:$0x3] }
 0x1d4   : > { %v1130_v29 = vmul.f32 0.015625, %v1129_v28  ;;  %v1196_v28 = vld [vmem:[%s2531_s6 + $0x10] sm:$0xff] }
 0x1d5   : > { %1221 = vmatpush.msra.mxu1 %v1196_v28 }
 0x1d6   : > { %v1795_v34 = vand.u32 2147483647, %v1130_v29  ;;  %v1812_v48 = vand.u32 2147483648, %v1130_v29  ;;  %vm1794_vm6 = vcmp.lt.f32.partialorder %v1130_v29, 0.0  ;;  %vm1793_vm7 = vcmp.eq.f32.partialorder %v1130_v29, 0.0 }
 0x1d8   : > { %1844 = vlog2.f32 %v1795_v34  ;;  %vm1809_vm4 = vweird.f32 %v1795_v34  ;;  %vm1811_vm5 = vcmp.eq.f32.partialorder %v1795_v34, 0.0  ;;  %vm1796_vm8 = vcmp.eq.f32.partialorder %v1795_v34, inf }
 0x1de   : > { %v1845_v35 = vpop.eup %1844 }
 0x1df   : > { %v1799_v38 = vmul.f32 -0.33333334, %v1845_v35 }
 0x1e1   : > { %1846 = vpow2.f32 %v1799_v38  ;;  %v1194_v38 = vld [vmem:[%s2531_s6] sm:$0xff] }
 0x1e7   : > { %v1847_v39 = vpop.eup %1846 }
 0x1e8   : > { %v1801_v41 = vmul.f32 %v1847_v39, %v1847_v39 }
 0x1ea   : > { %v1802_v30 = vmul.f32 %v1801_v41, %v1795_v34  ;;  %v1195_v34 = vld [vmem:[%s2531_s6 + $0x8] sm:$0xff] }
 0x1eb   : > { %1222 = vmatpush.msra.mxu1 %v1195_v34 }
 0x1ec   : > { %v1803_v42 = vmul.f32 %v1802_v30, %v1801_v41 }
 0x1ed   : > { %1223 = vmatpush.msra.mxu1 %v1194_v38 }
 0x1ee   : > { %v1804_v43 = vsub.f32 %v1803_v42, %v1847_v39 }
 0x1f0   : > { %v1805_v44 = vmul.f32 -0.33333334, %v1804_v43 }
 0x1f2   : > { %v1806_v45 = vadd.f32 %v1847_v39, %v1805_v44 }
 0x1f4   : > { %v1807_v33 = vmul.f32 %v1806_v45, %v1130_v29 }
 0x1f6   : > { %v1808_v36 = vmul.f32 %v1807_v33, %v1806_v45 }
 0x1f8   : > { %v1810_v31 = vsel %vm1809_vm4, %v1130_v29, %v1808_v36 }
 0x1f9   : > { %v1813_v49 = vsel %vm1811_vm5, %v1812_v48, %v1810_v31 }
 0x1fa   : > { %v1814_v50 = vsel %vm1794_vm6, nan, %v1813_v49 }
 0x1fb   : > { %v1815_v53 = vsel %vm1793_vm7, 0.0, %v1814_v50 }
 0x1fc   : > { %v2435_v25 = vsel %vm1796_vm8, inf, %v1815_v53 }
 0x1fd   : > { %1708 = vmatmul.msk.f32.vlgmr.msra.gmra.mxu0 %vm1070_vm1, %v2435_v25  ;;  %v1166_v54 = vmul.f32 %v2435_v25, %v2435_v25  ;;  %v1245_v55 = vrot.slane %v2435_v25, 1 }
 0x1ff   : > { %v1168_v57 = vperm.slane %v1166_v54, 0  ;;  %v1247_v59 = vmul.f32 %v1245_v55, %v1245_v55 }
 0x201   : > { %1169 = vrot.lane.b32.xlu0 %v1168_v57, %s1882_s10  ;;  %v1248_v60 = vsel %vm1172_vm9, %v1247_v59, 0.0 }
 0x202   : > { %1249 = vadd.xlane.f32.xlu1 %v1248_v60 }
 0x273   : > { %v1170_v32 = vpop.permute.xlu0 %1169 }
 0x274   : > { %v1173_v6 = vsel %vm1172_vm9, %v1170_v32, 0.0 }
 0x275   : > { %v1250_v7 = vpop.xlane.xlu1 %1249  ;;  %1174 = vadd.xlane.f32.xlu0 %v1173_v6 }
 0x276   : > { %v1251_v8 = vmax.f32 %v1250_v7, 1e-24 }
 0x278   : > { %1848 = vrsqrt.f32 %v1251_v8  ;;  %vm1258_vm12 = vweird.f32 %v1251_v8 }
 0x27a   : > { %v1161_v5 = vpop.f32.mrf.mxu0 }
 0x27b   : > { %v1162_v9 = vadd.f32 %v1161_v5, %v1140_v47 }
 0x27d   : > { %1165 = vst.msk [vmem:[%s339_s26] sm:$0x1] %vm1164_vm10, %v1162_v9 }
 0x27e   : > { %v1849_v10 = vpop.eup %1848 }
 0x27f   : > { %v1253_v56 = vmul.f32 %v1849_v10, %v1251_v8  ;;  %vm1259_vm11 = vweird.f32 %v1849_v10 }
 0x280   : > { %vm1260_vm13 = vmor %vm1258_vm12, %vm1259_vm11 }
 0x281   : > { %v1254_v11 = vmul.f32 %v1849_v10, %v1253_v56 }
 0x283   : > { %v1255_v12 = vmul.f32 0.5, %v1254_v11 }
 0x285   : > { %v1256_v13 = vsub.f32 1.5, %v1255_v12 }
 0x287   : > { %v1257_v14 = vmul.f32 %v1849_v10, %v1256_v13 }
 0x289   : > { %v1261_v15 = vsel %vm1260_vm13, %v1849_v10, %v1257_v14 }
 0x28a   : > { %v1262_v16 = vmul.f32 %v1261_v15, %v1245_v55 }
 0x28c   : > { %v1265_v18 = vsub.f32 %v1262_v16, %v1710_v37 }
 0x28e   : > { %1719 = vmatmul.msk.f32.vlgmr.msra.gmra.mxu2 %vm1070_vm1, %v1265_v18 }
 0x2e8   : > { %v1175_v17 = vpop.xlane.xlu0 %1174 }
 0x2e9   : > { %v1176_v19 = vmax.f32 %v1175_v17, 1e-24 }
 0x2eb   : > { %1850 = vrsqrt.f32 %v1176_v19  ;;  %vm1183_vm15 = vweird.f32 %v1176_v19 }
 0x2f1   : > { %v1851_v20 = vpop.eup %1850 }
 0x2f2   : > { %v1178_v21 = vmul.f32 %v1851_v20, %v1176_v19  ;;  %vm1184_vm14 = vweird.f32 %v1851_v20 }
 0x2f3   : > { %vm1185_vm0 = vmor %vm1183_vm15, %vm1184_vm14 }
 0x2f4   : > { %v1179_v46 = vmul.f32 %v1851_v20, %v1178_v21 }
 0x2f6   : > { %v1180_v24 = vmul.f32 0.5, %v1179_v46 }
 0x2f8   : > { %v1181_v58 = vsub.f32 1.5, %v1180_v24 }
 0x2fa   : > { %v1182_v27 = vmul.f32 %v1851_v20, %v1181_v58 }
 0x2fc   : > { %v1186_v29 = vsel %vm1185_vm0, %v1851_v20, %v1182_v27 }
 0x2fd   : > { %v1187_v35 = vmul.f32 %v2435_v25, %v1186_v29 }
 0x2ff   : > { %v1193_v39 = vsub.f32 %v1187_v35, %v1191_v2 }
 0x301   : > { %v1203_v41 = vperm.slane %v1193_v39, 0 }
 0x303   : > { %1204 = vrot.lane.b32.xlu2 %v1203_v41, %s1882_s10  ;;  %s1417_s10 = sshll.u32 %s2541_s27, 1 }
 0x304   : > { %s343_s13 = scalar_lea.vmem %s2533_s8, %s1417_s10 }
 0x311   : > { %v1295_v45 = vpop.f32.mrf.mxu2 }
 0x312   : > { %v1298_v33 = vmul.f32 %v1295_v45, %v1295_v45 }
 0x314   : > { %v1299_v36 = vsel %vm1164_vm10, %v1298_v33, 0.0 }
 0x35d   : > { %v1205_v30 = vpop.permute.xlu2 %1204 }
 0x35e   : > { %1709 = vmatmul.msk.f32.vlgmr.msra.gmra.mxu1 %vm1070_vm1, %v1205_v30 }
 0x3db   : > { %v1225_v42 = vpop.f32.mrf.mxu1 }
 0x3dc   : > { %v1228_v43 = vmul.f32 %v1225_v42, %v1225_v42 }
 0x3de   : > { %v1229_v44 = vsel %vm1164_vm10, %v1228_v43, 0.0 }
 0x3df   : > { %1230 = vadd.xlane.f32.xlu2 %v1229_v44 }
 0x3e7   : > { %1300 = vadd.xlane.f32.xlu2 %v1299_v36 }
 0x452   : > { %v1231_v48 = vpop.xlane.xlu2 %1230 }
 0x453   : > { %v1232_v31 = vmax.f32 %v1231_v48, 1e-24 }
 0x455   : > { %1852 = vrsqrt.f32 %v1232_v31  ;;  %vm1239_vm2 = vweird.f32 %v1232_v31 }
 0x45a   : > { %v1301_v49 = vpop.xlane.xlu2 %1300 }
 0x45b   : > { %v1853_v50 = vpop.eup %1852  ;;  %v1302_v53 = vmax.f32 %v1301_v49, 1e-24 }
 0x45c   : > { %v1234_v25 = vmul.f32 %v1853_v50, %v1232_v31  ;;  %vm1240_vm1 = vweird.f32 %v1853_v50 }
 0x45d   : > { %1854 = vrsqrt.f32 %v1302_v53  ;;  %vm1241_vm3 = vmor %vm1239_vm2, %vm1240_vm1  ;;  %vm1309_vm5 = vweird.f32 %v1302_v53 }
 0x45e   : > { %v1235_v54 = vmul.f32 %v1853_v50, %v1234_v25 }
 0x460   : > { %v1236_v55 = vmul.f32 0.5, %v1235_v54 }
 0x462   : > { %v1237_v57 = vsub.f32 1.5, %v1236_v55 }
 0x463   : > { %v1855_v59 = vpop.eup %1854 }
 0x464   : > { %v1238_v60 = vmul.f32 %v1853_v50, %v1237_v57  ;;  %v1304_v61 = vmul.f32 %v1855_v59, %v1302_v53  ;;  %vm1310_vm4 = vweird.f32 %v1855_v59 }
 0x465   : > { %vm1311_vm6 = vmor %vm1309_vm5, %vm1310_vm4 }
 0x466   : > { %v1242_v3 = vsel %vm1241_vm3, %v1853_v50, %v1238_v60  ;;  %v1305_v23 = vmul.f32 %v1855_v59, %v1304_v61 }
 0x467   : > { %v1243_v63 = vmul.f32 %v1242_v3, %v1225_v42 }
 0x468   : > { %v1306_v0 = vmul.f32 0.5, %v1305_v23 }
 0x469   : > { %1244 = vst.msk [vmem:[%s343_s13] sm:$0x1] %vm1164_vm10, %v1243_v63 }
 0x46a   : > { %v1307_v40 = vsub.f32 1.5, %v1306_v0 }
 0x46c   : > { %v1308_v62 = vmul.f32 %v1855_v59, %v1307_v40 }
 0x46e   : > { %v1312_v2 = vsel %vm1311_vm6, %v1855_v59, %v1308_v62 }
 0x46f   : > { %v1313_v4 = vmul.f32 %v1312_v2, %v1295_v45 }
 0x471   : > { %1314 = vst.msk [vmem:[%s343_s13 + $0x1] sm:$0x1] %vm1164_vm10, %v1313_v4 }
 0x472 PF: > { %s19_s29 = sadd.s32 1, %s1878_s29   ;;  %s2536_s27 = smov %s1874_s28 }
 0x473   : > { %p16_p5 = scmp.ge.s32.totalorder %s19_s29, 6   ;;  %s2537_s28 = smov %s2539_s30 }
 0x475   :  { %18 = sbr.rel (!%p16_p5) target bundleno = 2 (0x2), region = 100 }

</bundles_post_ra>
